<compile_context>
chip_gen: v7x
topology: tpu7x:2x2x1
jax: 0.10.0
libtpu: 0.0.40
codegen_flags: <defaults>
</compile_context>

<pallas_src>
from functools import partial

import jax
import jax.numpy as jnp
from jax.experimental import pallas as pl
from jax.experimental.pallas import tpu as pltpu

BN_EPS = 1e-5
_VMEM_TILE_BUDGET = 12 * 1024 * 1024


# ----------------------------- small helpers --------------------------------

def _round_up(v, m):
    return ((v + m - 1) // m) * m


def _pick_tn(cout):
    if cout <= 1024:
        return cout
    for tn in (1024, 768, 512, 384, 256, 128):
        if cout % tn == 0:
            return tn
    return cout


def _pick_tm(m, k, tn, has_res):
    chosen = 16
    for tm in (512, 256, 128, 64, 32, 16):
        fp = (2 * tm * k * 2            # A tile (bf16, double-buffered)
              + 2 * k * tn * 2          # W tile (bf16, double-buffered)
              + 2 * tm * tn * 4         # output tile (f32, double-buffered)
              + (2 * tm * tn * 4 if has_res else 0)
              + tm * tn * 4)            # accumulator scratch
        if fp <= _VMEM_TILE_BUDGET:
            chosen = tm
            break
    return min(chosen, _round_up(m, 16))


# ----------------------------- Pallas kernels -------------------------------

def _make_gemm_kernel(pre, post, res):
    """GEMM with tap-reduction; optional BN+ReLU pre-op on A, BN+ReLU epilogue,
    and fused residual add at write-out."""

    def kernel(*refs):
        i = 2
        a_ref, w_ref = refs[0], refs[1]
        if pre:
            ps_ref, pb_ref = refs[i], refs[i + 1]
            i += 2
        if post:
            qs_ref, qb_ref = refs[i], refs[i + 1]
            i += 2
        if res:
            r_ref = refs[i]
            i += 1
        o_ref, acc_ref = refs[i], refs[i + 1]

        t = pl.program_id(2)

        a = a_ref[...]
        if pre:
            a = jnp.maximum(a.astype(jnp.float32) * ps_ref[...] + pb_ref[...], 0.0)
            a = a.astype(jnp.bfloat16)
        part = jnp.dot(a, w_ref[...], preferred_element_type=jnp.float32)

        @pl.when(t == 0)
        def _init():
            acc_ref[...] = jnp.zeros_like(acc_ref)

        acc_ref[...] += part

        @pl.when(t == pl.num_programs(2) - 1)
        def _finish():
            out = acc_ref[...]
            if post:
                out = jnp.maximum(out * qs_ref[...] + qb_ref[...], 0.0)
            if res:
                out = out + r_ref[...]
            o_ref[...] = out.astype(o_ref.dtype)

    return kernel


def _max9_kernel(x_ref, o_ref):
    o_ref[...] = jnp.max(x_ref[...], axis=0)


def _bn_relu_mean_kernel(x_ref, s_ref, t_ref, o_ref):
    y = jnp.maximum(x_ref[...] * s_ref[...] + t_ref[...], 0.0)
    o_ref[...] = jnp.mean(y, axis=0, keepdims=True)


# --------------------------- fused GEMM wrapper ------------------------------

@jax.jit
def fused_gemm(a, w, pre_bn, post_bn, residual):
    """a: (kv, M, K) bf16 taps; w: (kv, K, Cout) bf16.
    Returns (M, Cout) f32 = [residual +] [postBNReLU] sum_t preBNReLU(a[t]) @ w[t]."""
    kv, M, K = a.shape
    Cout = w.shape[2]
    pre = pre_bn is not None
    post = post_bn is not None
    res = residual is not None

    tn = _pick_tn(Cout)
    tm = _pick_tm(M, K, tn, res)
    Mp = _round_up(M, tm)
    if Mp != M:
        a = jnp.pad(a, ((0, 0), (0, Mp - M), (0, 0)))

    grid = (Mp // tm, Cout // tn, kv)
    ops = [a, w]
    in_specs = [
        pl.BlockSpec((None, tm, K), lambda m, n, t: (t, m, 0)),
        pl.BlockSpec((None, K, tn), lambda m, n, t: (t, 0, n)),
    ]
    if pre:
        ops += [pre_bn[0].reshape(1, K).astype(jnp.float32),
                pre_bn[1].reshape(1, K).astype(jnp.float32)]
        in_specs += [pl.BlockSpec((1, K), lambda m, n, t: (0, 0)),
                     pl.BlockSpec((1, K), lambda m, n, t: (0, 0))]
    if post:
        ops += [post_bn[0].reshape(1, Cout).astype(jnp.float32),
                post_bn[1].reshape(1, Cout).astype(jnp.float32)]
        in_specs += [pl.BlockSpec((1, tn), lambda m, n, t: (0, n)),
                     pl.BlockSpec((1, tn), lambda m, n, t: (0, n))]
    if res:
        r = residual.astype(jnp.float32)
        if Mp != M:
            r = jnp.pad(r, ((0, Mp - M), (0, 0)))
        ops.append(r)
        in_specs.append(pl.BlockSpec((tm, tn), lambda m, n, t: (m, n)))

    grid_spec = pltpu.PrefetchScalarGridSpec(
        num_scalar_prefetch=0,
        grid=grid,
        in_specs=in_specs,
        out_specs=pl.BlockSpec((tm, tn), lambda m, n, t: (m, n)),
        scratch_shapes=[pltpu.VMEM((tm, tn), jnp.float32)],
    )
    out = pl.pallas_call(
        _make_gemm_kernel(pre, post, res),
        out_shape=jax.ShapeDtypeStruct((Mp, Cout), jnp.float32),
        grid_spec=grid_spec,
        compiler_params=pltpu.CompilerParams(
            dimension_semantics=("parallel", "parallel", "arbitrary"),
            vmem_limit_bytes=32 * 1024 * 1024),
    )(*ops)
    return out[:M]


# --------------------------- convolution glue --------------------------------

@partial(jax.jit, static_argnames=("kernel", "stride", "pad", "groups"))
def _conv3d_fused(x, w, pre_bn, post_bn, residual, *, kernel, stride, pad, groups):
    N, D, H, W_, Cin = x.shape
    kt, kh, kw = kernel
    st, sh, sw = stride
    pt, ph, pw = pad
    kv = kt * kh * kw
    Cout = w.shape[-1]
    Do = (D + 2 * pt - kt) // st + 1
    Ho = (H + 2 * ph - kh) // sh + 1
    Wo = (W_ + 2 * pw - kw) // sw + 1
    M = N * Do * Ho * Wo

    if pt or ph or pw:
        widths = ((0, 0), (pt, pt), (ph, ph), (pw, pw), (0, 0))
        if pre_bn is not None:
            # BN+ReLU is applied inside the GEMM kernel, so the conv's zero
            # padding must map to zero after BN+ReLU: pad with -shift/scale
            # so relu(scale*v + shift) == 0 at padded positions.
            s, b = pre_bn
            pad_val = -b / jnp.where(s == 0, 1.0, s)
            xp = jnp.pad(x - pad_val, widths) + pad_val
        else:
            xp = jnp.pad(x, widths)
    else:
        xp = x
    xp = xp.astype(jnp.bfloat16)  # GEMM operands bf16; accumulation stays f32.

    taps = []
    for dt in range(kt):
        for dh in range(kh):
            for dw in range(kw):
                taps.append(xp[:, dt:dt + st * Do:st,
                               dh:dh + sh * Ho:sh,
                               dw:dw + sw * Wo:sw, :])

    if groups == 1 and kv > 1:
        # conv1 special case: fold taps into the contraction dim (dense GEMM).
        assert pre_bn is None
        a = jnp.stack(taps, axis=-2).reshape(1, M, kv * Cin)
        wk = w.reshape(1, kv * Cin, Cout)
    elif kv == 1:
        a = taps[0].reshape(1, M, Cin)
        wk = w
    else:
        a = jnp.stack(taps, axis=0).reshape(kv, M, Cin)
        wk = w

    r2 = None if residual is None else residual.reshape(M, Cout)
    out = fused_gemm(a, wk, pre_bn, post_bn, r2)
    return out.reshape(N, Do, Ho, Wo, Cout)


def bac_conv(x, layer, residual=None):
    return _conv3d_fused(
        x, layer["w"], layer["pre_bn"], layer["post_bn"], residual,
        kernel=layer["kernel"], stride=layer["stride"], pad=layer["pad"],
        groups=layer["g"])


# -------------------------- pooling kernels ----------------------------------

@jax.jit
def maxpool3d_1x3x3_s122(x):
    """MaxPool3d(kernel=(1,3,3), stride=(1,2,2), padding=(0,1,1)); lane-dense."""
    N, D, H, W_, C = x.shape
    Ho = (H + 2 - 3) // 2 + 1
    Wo = (W_ + 2 - 3) // 2 + 1
    neg = float(jnp.finfo(jnp.float32).min)
    xp = jnp.pad(x, ((0, 0), (0, 0), (1, 1), (1, 1), (0, 0)), constant_values=neg)
    taps = [xp[:, :, dh:dh + 2 * Ho:2, dw:dw + 2 * Wo:2, :]
            for dh in range(3) for dw in range(3)]
    t = jnp.stack(taps, axis=0).reshape(9, -1)
    L = t.shape[1]
    rows = pl.cdiv(L, 128)
    tr = min(512, _round_up(rows, 8))
    rows_p = _round_up(rows, tr)
    Lp = rows_p * 128
    if Lp != L:
        t = jnp.pad(t, ((0, 0), (0, Lp - L)), constant_values=neg)
    t = t.reshape(9, rows_p, 128)
    out = pl.pallas_call(
        _max9_kernel,
        out_shape=jax.ShapeDtypeStruct((rows_p, 128), jnp.float32),
        grid=(rows_p // tr,),
        in_specs=[pl.BlockSpec((9, tr, 128), lambda i: (0, i, 0))],
        out_specs=pl.BlockSpec((tr, 128), lambda i: (i, 0)),
        compiler_params=pltpu.CompilerParams(dimension_semantics=("parallel",)),
    )(t)
    return out.reshape(-1)[:L].reshape(N, D, Ho, Wo, C)


@jax.jit
def bn_relu_avgpool(x, scale, shift):
    """Fused eval-mode BN -> ReLU -> global average pool: (N,D,H,W,C) -> (N,C)."""
    N, D, H, W_, C = x.shape
    R = D * H * W_
    xr = x.reshape(N, R, C)
    out = pl.pallas_call(
        _bn_relu_mean_kernel,
        out_shape=jax.ShapeDtypeStruct((N, 1, C), jnp.float32),
        grid=(N,),
        in_specs=[pl.BlockSpec((None, R, C), lambda n: (n, 0, 0)),
                  pl.BlockSpec((1, C), lambda n: (0, 0)),
                  pl.BlockSpec((1, C), lambda n: (0, 0))],
        out_specs=pl.BlockSpec((None, 1, C), lambda n: (n, 0, 0)),
        compiler_params=pltpu.CompilerParams(dimension_semantics=("parallel",)),
    )(xr, scale.reshape(1, C), shift.reshape(1, C))
    return out[:, 0, :]


@jax.jit
def classifier_head(feats, weights, biases):
    """x1+x2+x3 of three Linears == one GEMM on concatenated features."""
    f = jnp.concatenate(feats, axis=1).astype(jnp.bfloat16)
    wcat = jnp.concatenate([jnp.transpose(w) for w in weights],
                           axis=0).astype(jnp.bfloat16)
    bias = biases[0] + biases[1] + biases[2]
    logits = fused_gemm(f[None], wcat[None], None, None, None)
    return logits + bias[None, :]


# ------------------------------ parameters -----------------------------------

def make_bn(C):
    # TODO(synk): PyTorch module default is train() mode (batch statistics);
    # eval-mode running statistics (mean=0, var=1, gamma=1, beta=0) are used here.
    gamma = jnp.ones((C,), jnp.float32)
    beta = jnp.zeros((C,), jnp.float32)
    mean = jnp.zeros((C,), jnp.float32)
    var = jnp.ones((C,), jnp.float32)
    scale = gamma / jnp.sqrt(var + BN_EPS)
    shift = beta - mean * scale
    return scale, shift


def conv_weight(key, cout, cin_g, kernel):
    kt, kh, kw = kernel
    fan_in = cin_g * kt * kh * kw
    std = (2.0 / fan_in) ** 0.5
    return std * jax.random.normal(key, (cout, cin_g, kt, kh, kw), jnp.float32)


def prep_conv_weight(w, groups):
    """PyTorch (Cout, Cin/g, kt, kh, kw) -> per-tap (kv, Cin, Cout) bf16;
    grouped convs expand to a block-diagonal weight (lane-dense GEMM output)."""
    Cout, Cg, kt, kh, kw = w.shape
    kv = kt * kh * kw
    Cin = Cg * groups
    if groups == 1:
        wk = jnp.transpose(w.reshape(Cout, Cin, kv), (2, 1, 0))
    else:
        G = groups
        ng = Cout // G
        wt = jnp.transpose(w.reshape(G, ng, Cg, kv), (3, 0, 2, 1))   # (kv,G,Cg,ng)
        eye = jnp.eye(G, dtype=w.dtype)
        wk = jnp.einsum('tgcn,gh->tgchn', wt, eye).reshape(kv, Cin, Cout)
    return wk.astype(jnp.bfloat16)


def make_bac(keys, num_in, num_filter, kernel=(1, 1, 1), pad=(0, 0, 0),
             stride=(1, 1, 1), g=1):
    w = conv_weight(next(keys), num_filter, num_in // g, kernel)
    return {"w": prep_conv_weight(w, g), "pre_bn": make_bn(num_in),
            "post_bn": None, "kernel": kernel, "pad": pad, "stride": stride, "g": g}


def make_mf_unit(keys, num_in, num_mid, num_out, g, stride, first_block):
    num_ix = num_mid // 4
    p = {"first": first_block,
         "conv_i1": make_bac(keys, num_in, num_ix),
         "conv_i2": make_bac(keys, num_ix, num_in),
         "conv_m1": make_bac(keys, num_in, num_mid, kernel=(3, 3, 3),
                             pad=(1, 1, 1), stride=stride, g=g)}
    if first_block:
        p["conv_m2"] = make_bac(keys, num_mid, num_out)
        p["conv_w1"] = make_bac(keys, num_in, num_out, stride=stride)
    else:
        p["conv_m2"] = make_bac(keys, num_mid, num_out, kernel=(1, 3, 3),
                                pad=(0, 1, 1), g=g)
    return p


def make_backbone(keys):
    groups = 16
    k_sec = {2: 3, 3: 4, 4: 6, 5: 3}
    conv1_out = 16
    w1 = conv_weight(next(keys), conv1_out, 3, (3, 5, 5))
    params = {"conv1": {"w": prep_conv_weight(w1, 1), "pre_bn": None,
                        "post_bn": make_bn(conv1_out), "kernel": (3, 5, 5),
                        "pad": (1, 2, 2), "stride": (1, 2, 2), "g": 1}}
    num_mid, num_out, prev = 96, 96, conv1_out
    for stage in (2, 3, 4, 5):
        blocks = []
        for i in range(1, k_sec[stage] + 1):
            num_in = prev if i == 1 else num_out
            if stage == 2:
                stride = (2, 1, 1) if i == 1 else (1, 1, 1)
            else:
                stride = (1, 2, 2) if i == 1 else (1, 1, 1)
            blocks.append(make_mf_unit(keys, num_in, num_mid, num_out,
                                       groups, stride, i == 1))
        params["conv%d" % stage] = blocks
        prev = num_out
        num_mid *= 2
        num_out *= 2
    return params, prev


def make_params(num_classes, seed=1):
    keys = iter(jax.random.split(jax.random.PRNGKey(seed), 256))
    backbone, feat_dim = make_backbone(keys)          # feat_dim == 768
    params = {"backbone": backbone}
    for name, d in (("proj1", 512), ("proj2", 2304), ("proj3", 2048)):
        params[name] = {"unit": make_mf_unit(keys, feat_dim, d, d, 16,
                                             (1, 1, 1), True),
                        "bn": make_bn(d)}
    for i, d in ((1, 512), (2, 2304), (3, 2048)):
        limit = (6.0 / (d + num_classes)) ** 0.5
        params["fc%d_w" % i] = jax.random.uniform(next(keys), (num_classes, d),
                                                  jnp.float32, -limit, limit)
        params["fc%d_b" % i] = jnp.zeros((num_classes,), jnp.float32)
    return params


# -------------------------------- forward ------------------------------------

def mf_unit(x, p):
    h = bac_conv(x, p["conv_i1"])
    x_in = bac_conv(h, p["conv_i2"], residual=x)         # x + conv_i2(...) fused
    h = bac_conv(x_in, p["conv_m1"])
    if p["first"]:
        x = bac_conv(x, p["conv_w1"])
    h = bac_conv(h, p["conv_m2"], residual=x)            # h + x fused
    return h


def ensemble_forward(params, x_ncdhw):
    x = x_ncdhw[:, :, ::4, :, :]                         # temporal subsample 64 -> 16
    assert x.shape[2] == 16
    h = jnp.transpose(x, (0, 2, 3, 4, 1)).astype(jnp.float32)   # NCDHW -> NDHWC

    bb = params["backbone"]
    h = bac_conv(h, bb["conv1"])                         # Conv + fused BN+ReLU epilogue
    h = maxpool3d_1x3x3_s122(h)
    for stage in (2, 3, 4, 5):
        for blk in bb["conv%d" % stage]:
            h = mf_unit(h, blk)

    feats = []
    for name in ("proj1", "proj2", "proj3"):
        pp = params[name]
        f = mf_unit(h, pp["unit"])
        feats.append(bn_relu_avgpool(f, pp["bn"][0], pp["bn"][1]))

    # TODO(synk): nn.Dropout(p=0.8) is treated as identity (eval mode); the
    # training-mode random mask is not implemented.
    logits = classifier_head(
        tuple(feats),
        (params["fc1_w"], params["fc2_w"], params["fc3_w"]),
        (params["fc1_b"], params["fc2_b"], params["fc3_b"]))
    return logits


if __name__ == "__main__":
    num_classes = 10
    params = make_params(num_classes, seed=1)
    # Smallest input consistent with the module: the temporal ::4 subsample plus
    # the backbone assert fix T=64; 16x16 spatial keeps every stride/pool stage
    # valid while staying tiny (AdaptiveAvgPool makes the spatial size free).
    x = jax.random.normal(jax.random.PRNGKey(0), (1, 3, 64, 16, 16), jnp.float32)
    out = ensemble_forward(params, x)
    out = jax.block_until_ready(out)
    assert out.shape == (1, num_classes)
    assert bool(jnp.all(jnp.isfinite(out)))
    print("KERNEL_OK")
</pallas_src>

<mosaic_0001>
module attributes {stable_mosaic.version = 11 : i64} {
  func.func @kernel(%arg0: i32, %arg1: i32, %arg2: i32, %arg3: memref<1x512x225xbf16, #tpu.memory_space<vmem>>, %arg4: memref<1x225x16xbf16, #tpu.memory_space<vmem>>, %arg5: memref<1x16xf32, #tpu.memory_space<vmem>>, %arg6: memref<1x16xf32, #tpu.memory_space<vmem>>, %arg7: memref<512x16xf32, #tpu.memory_space<vmem>>, %arg8: memref<512x16xf32, #tpu.memory_space<vmem>>) attributes {dimension_semantics = [#tpu.dimension_semantics<parallel>, #tpu.dimension_semantics<parallel>, #tpu.dimension_semantics<arbitrary>], iteration_bounds = array<i64: 2, 1, 1>, scalar_prefetch = 0 : i64, scratch_operands = 1 : i64, tpu.core_type = #tpu.core_type<tc>, window_params = [{transform_indices = @transform_0, window_bounds = array<i64: 1, 512, 225>}, {transform_indices = @transform_1, window_bounds = array<i64: 1, 225, 16>}, {transform_indices = @transform_2, window_bounds = array<i64: 1, 16>}, {transform_indices = @transform_3, window_bounds = array<i64: 1, 16>}, {transform_indices = @transform_4, window_bounds = array<i64: 512, 16>}]} {
    %c0 = arith.constant 0 : index
    %c0_0 = arith.constant 0 : index
    %c0_1 = arith.constant 0 : index
    %0 = vector.load %arg3[%c0, %c0_0, %c0_1] : memref<1x512x225xbf16, #tpu.memory_space<vmem>>, vector<1x512x225xbf16>
    %1 = vector.shape_cast %0 : vector<1x512x225xbf16> to vector<512x225xbf16>
    %c0_2 = arith.constant 0 : index
    %c0_3 = arith.constant 0 : index
    %c0_4 = arith.constant 0 : index
    %2 = vector.load %arg4[%c0_2, %c0_3, %c0_4] : memref<1x225x16xbf16, #tpu.memory_space<vmem>>, vector<1x225x16xbf16>
    %3 = vector.shape_cast %2 : vector<1x225x16xbf16> to vector<225x16xbf16>
    %cst = arith.constant dense<0.000000e+00> : vector<512x16xf32>
    %4 = tpu.matmul %1, %3, %cst {dimension_numbers = #tpu.dot_dimension_numbers<[1], [0], [0], [1], [0, 0, 1, 1], [], []>} : vector<512x225xbf16>, vector<225x16xbf16>, vector<512x16xf32> -> vector<512x16xf32>
    %c0_i32 = arith.constant 0 : i32
    %5 = arith.cmpi eq, %arg2, %c0_i32 : i32
    %6 = arith.extui %5 : i1 to i32
    %c0_i32_5 = arith.constant 0 : i32
    %7 = arith.cmpi ne, %6, %c0_i32_5 : i32
    scf.if %7 {
      %cst_12 = arith.constant 0.000000e+00 : f32
      %14 = vector.broadcast %cst_12 : f32 to vector<512x16xf32>
      %c0_13 = arith.constant 0 : index
      %c0_14 = arith.constant 0 : index
      %15 = vector.load %arg8[%c0_13, %c0_14] : memref<512x16xf32, #tpu.memory_space<vmem>>, vector<512x16xf32>
      tpu.vector_store %arg8[%c0_13, %c0_14], %14 {strides = array<i32>} : memref<512x16xf32, #tpu.memory_space<vmem>>, vector<512x16xf32>,
    } else {
    }
    %c0_6 = arith.constant 0 : index
    %c0_7 = arith.constant 0 : index
    %8 = vector.load %arg8[%c0_6, %c0_7] : memref<512x16xf32, #tpu.memory_space<vmem>>, vector<512x16xf32>
    %9 = arith.addf %8, %4 : vector<512x16xf32>
    %c0_8 = arith.constant 0 : index
    %c0_9 = arith.constant 0 : index
    %10 = vector.load %arg8[%c0_8, %c0_9] : memref<512x16xf32, #tpu.memory_space<vmem>>, vector<512x16xf32>
    tpu.vector_store %arg8[%c0_8, %c0_9], %9 {strides = array<i32>} : memref<512x16xf32, #tpu.memory_space<vmem>>, vector<512x16xf32>,
    %c0_i32_10 = arith.constant 0 : i32
    %11 = arith.cmpi eq, %arg2, %c0_i32_10 : i32
    %12 = arith.extui %11 : i1 to i32
    %c0_i32_11 = arith.constant 0 : i32
    %13 = arith.cmpi ne, %12, %c0_i32_11 : i32
    scf.if %13 {
      %c0_12 = arith.constant 0 : index
      %c0_13 = arith.constant 0 : index
      %14 = vector.load %arg8[%c0_12, %c0_13] : memref<512x16xf32, #tpu.memory_space<vmem>>, vector<512x16xf32>
      %c0_14 = arith.constant 0 : index
      %c0_15 = arith.constant 0 : index
      %15 = vector.load %arg5[%c0_14, %c0_15] : memref<1x16xf32, #tpu.memory_space<vmem>>, vector<1x16xf32>
      %16 = vector.broadcast %15 : vector<1x16xf32> to vector<512x16xf32>
      %17 = arith.mulf %14, %16 : vector<512x16xf32>
      %c0_16 = arith.constant 0 : index
      %c0_17 = arith.constant 0 : index
      %18 = vector.load %arg6[%c0_16, %c0_17] : memref<1x16xf32, #tpu.memory_space<vmem>>, vector<1x16xf32>
      %19 = vector.broadcast %18 : vector<1x16xf32> to vector<512x16xf32>
      %20 = arith.addf %17, %19 : vector<512x16xf32>
      %cst_18 = arith.constant 0.000000e+00 : f32
      %21 = vector.broadcast %cst_18 : f32 to vector<512x16xf32>
      %22 = arith.maximumf %20, %21 : vector<512x16xf32>
      %c0_19 = arith.constant 0 : index
      %c0_20 = arith.constant 0 : index
      %23 = vector.load %arg7[%c0_19, %c0_20] : memref<512x16xf32, #tpu.memory_space<vmem>>, vector<512x16xf32>
      tpu.vector_store %arg7[%c0_19, %c0_20], %22 {strides = array<i32>} : memref<512x16xf32, #tpu.memory_space<vmem>>, vector<512x16xf32>,
    } else {
    }
    return
  }
  func.func @transform_0(%arg0: i32, %arg1: i32, %arg2: i32) -> (i32, i32, i32) {
    %c0_i32 = arith.constant 0 : i32
    %c0_i32_0 = arith.constant 0 : i32
    return %arg2, %arg0, %c0_i32 : i32, i32, i32
  }
  func.func @transform_1(%arg0: i32, %arg1: i32, %arg2: i32) -> (i32, i32, i32) {
    %c0_i32 = arith.constant 0 : i32
    %c0_i32_0 = arith.constant 0 : i32
    return %arg2, %c0_i32, %arg1 : i32, i32, i32
  }
  func.func @transform_2(%arg0: i32, %arg1: i32, %arg2: i32) -> (i32, i32) {
    %c0_i32 = arith.constant 0 : i32
    %c0_i32_0 = arith.constant 0 : i32
    return %c0_i32, %arg1 : i32, i32
  }
  func.func @transform_3(%arg0: i32, %arg1: i32, %arg2: i32) -> (i32, i32) {
    %c0_i32 = arith.constant 0 : i32
    %c0_i32_0 = arith.constant 0 : i32
    return %c0_i32, %arg1 : i32, i32
  }
  func.func @transform_4(%arg0: i32, %arg1: i32, %arg2: i32) -> (i32, i32) {
    %c0_i32 = arith.constant 0 : i32
    return %arg0, %arg1 : i32, i32
  }
}

</mosaic_0001>

<bundles_post_ra>
// kernel: fused_gemm.1
= control target key start
LH: loop header
LB: loop body
LE: loop exit
PB: predicated region body
PF: predicated region fallthrough
CT: control target
= control target key end

     0   :  { %s2245_s15 = smov 0   ;;  %s2247_s16 = smov 0   ;;  %s2935_s0 = inlined_call_operand.vmem [shape: bf16[1,1024,225], index: 0, kind: input, shape index: {}]   ;;  %s2936_s1 = inlined_call_operand.vmem [shape: bf16[1,225,16], index: 1, kind: input, shape index: {}]   ;;  %s2937_s2 = inlined_call_operand.vmem [shape: f32[1,16], index: 2, kind: input, shape index: {}]   ;;  %s2938_s3 = inlined_call_operand.vmem [shape: f32[1,16], index: 3, kind: input, shape index: {}]   ;;  %s2939_s4 = inlined_call_operand.vmem [shape: f32[1024,16], index: 4, kind: output, shape index: {}]  }
   0x1   :  { %s2249_s17 = smov 0  }
   0x2 LB: > { %s33_s18 = sadd.s32 1, %s2212_s16  ;;  %p1903_p0 = scmp.ge.s32.totalorder %s2216_s17, 1  ;;  %s2216_s17 = sphi %s2249_s17, %s14_s17   ;;  %s2212_s16 = sphi %s2247_s16, %s2941_s16   ;;  %s2208_s15 = sphi %s2245_s15, %s2940_s15  }
   0x3   : > { %p35_p1 = scmp.ge.s32.totalorder %s33_s18, 2  ;;  %p222_p2 = scmp.lt.s32.totalorder %s2216_s17, 3 }
   0x5   : > { %s2943_s18 = smov (%p35_p1, %s33_s18), 0  ;;  %p223_p3 = pnand %p1903_p0, %p222_p2 }
   0x6   : > { %v2081_v0 = vld [vmem:[%s2936_s1] sm:$0xff] (!%p223_p3)   ;;  %v2218_v1 = vmov (!%p223_p3), 0   ;;  %v2082_v2 = vld [vmem:[%s2936_s1 + $0x8] sm:$0xff] (!%p223_p3)   ;;  %s1904_s23 = sshll.u32 (!%p223_p3), %s2208_s15, 6  ;;  %v2083_v3 = vld [vmem:[%s2936_s1 + $0x10] sm:$0xff] (!%p223_p3)   ;;  %vm773_vm0 = vcmask (!%p223_p3), 793600  }
   0x7   : > { %226 = sbr.rel (%p223_p3) target bundleno = 419 (0x1a3), region = 36  ;;  %876 = vmatprep.subr.bf16.mxu0 (!%p223_p3), %v2218_v1  ;;  %2025 = vmatprep.subr.bf16.mxu1 (!%p223_p3), %v2218_v1  ;;  %p273_p4 = scmp.lt.s32.totalorder (!%p223_p3), %s1904_s23, 127  ;;  %v2084_v4 = vld [vmem:[%s2936_s1 + $0x18] sm:$0xff] (!%p223_p3)   ;;  %v2085_v5 = vld [vmem:[%s2936_s1 + $0x20] sm:$0xff] (!%p223_p3)   ;;  %v2086_v8 = vld [vmem:[%s2936_s1 + $0x28] sm:$0xff] (!%p223_p3)   ;;  %vm870_vm1 = vcmask (!%p223_p3), 1040384  }
   0x8   : > { %877 = vmatpush1.bf16.msra.mxu0 (!%p223_p3), %v2081_v0  ;;  %2040 = vmatpush1.bf16.msra.mxu1 (!%p223_p3), %v2081_v0  ;;  %v2087_v9 = vld [vmem:[%s2936_s1 + $0x30] sm:$0xff] (!%p223_p3)   ;;  %v2088_v10 = vld [vmem:[%s2936_s1 + $0x38] sm:$0xff] (!%p223_p3)   ;;  %v2089_v11 = vld [vmem:[%s2936_s1 + $0x40] sm:$0xff] (!%p223_p3)   ;;  %v872_v18 = vsel (!%p223_p3), %vm870_vm1, 65535, %v2218_v1  ;;  %vm1169_vm2 = vcmask (!%p223_p3), 130048   ;;  %v2219_v62 = vmov (!%p223_p3), 0.0  }
   0x9   : > { %878 = vmatprep.subr.bf16.mxu0 (!%p223_p3), %v2218_v1  ;;  %2026 = vmatprep.subr.bf16.mxu1 (!%p223_p3), %v2218_v1  ;;  %v2090_v12 = vld [vmem:[%s2936_s1 + $0x48] sm:$0xff] (!%p223_p3)   ;;  %v2091_v13 = vld [vmem:[%s2936_s1 + $0x50] sm:$0xff] (!%p223_p3)   ;;  %v2092_v14 = vld [vmem:[%s2936_s1 + $0x58] sm:$0xff] (!%p223_p3)   ;;  %1170 = vst.msk [vmem:[#allocation2] sm:$0xff] (!%p223_p3), %vm1169_vm2, %v2219_v62 }
   0xa   : > { %v2093_v15 = vld [vmem:[%s2936_s1 + $0x60] sm:$0xff] (!%p223_p3)   ;;  %v2094_v16 = vld [vmem:[%s2936_s1 + $0x68] sm:$0xff] (!%p223_p3)   ;;  %v2095_v17 = vld [vmem:[%s2936_s1 + $0x70] ss:$0 sps:$4 sm:$0x11] (!%p223_p3)   ;;  %1171 = vst.msk [vmem:[#allocation2 + $0x8] sm:$0xff] (!%p223_p3), %vm1169_vm2, %v2219_v62 }
   0xb   : > { %v874_v19 = vand.u32 (!%p223_p3), %v2095_v17, %v872_v18  ;;  %1172 = vst.msk [vmem:[#allocation2 + $0x10] sm:$0xff] (!%p223_p3), %vm1169_vm2, %v2219_v62  ;;  %1173 = vst.msk [vmem:[#allocation2 + $0x18] sm:$0xff] (!%p223_p3), %vm1169_vm2, %v2219_v62 }
   0xc   : > { %879 = vmatpush1.bf16.msra.mxu0 (!%p223_p3), %v2082_v2  ;;  %2041 = vmatpush1.bf16.msra.mxu1 (!%p223_p3), %v2082_v2  ;;  %1174 = vst.msk [vmem:[#allocation2 + $0x20] sm:$0xff] (!%p223_p3), %vm1169_vm2, %v2219_v62  ;;  %1175 = vst.msk [vmem:[#allocation2 + $0x28] sm:$0xff] (!%p223_p3), %vm1169_vm2, %v2219_v62 }
   0xd   : > { %880 = vmatprep.subr.bf16.mxu0 (!%p223_p3), %v2218_v1  ;;  %2027 = vmatprep.subr.bf16.mxu1 (!%p223_p3), %v2218_v1  ;;  %1176 = vst.msk [vmem:[#allocation2 + $0x30] sm:$0xff] (!%p223_p3), %vm1169_vm2, %v2219_v62  ;;  %1177 = vst.msk [vmem:[#allocation2 + $0x38] sm:$0xff] (!%p223_p3), %vm1169_vm2, %v2219_v62 }
   0xe   : > { %s2945_s23 = smov (!%p273_p4, %s1904_s23), 127  ;;  %1178 = vst.msk [vmem:[#allocation2 + $0x40] sm:$0xff] %vm1169_vm2, %v2219_v62  ;;  %1179 = vst.msk [vmem:[#allocation2 + $0x48] sm:$0xff] %vm1169_vm2, %v2219_v62 }
   0xf   : > { %s2024_s26 = sshll.u32 %s2945_s23, 3  ;;  %1180 = vst.msk [vmem:[#allocation2 + $0x50] sm:$0xff] %vm1169_vm2, %v2219_v62  ;;  %1181 = vst.msk [vmem:[#allocation2 + $0x58] sm:$0xff] %vm1169_vm2, %v2219_v62 }
  0x10   : > { %881 = vmatpush1.bf16.msra.mxu0 %v2083_v3  ;;  %2042 = vmatpush1.bf16.msra.mxu1 %v2083_v3  ;;  %s2291_s5 = scalar_lea.vmem %s2935_s0, %s2024_s26  ;;  %1182 = vst.msk [vmem:[#allocation2 + $0x60] sm:$0xff] %vm1169_vm2, %v2219_v62  ;;  %1183 = vst.msk [vmem:[#allocation2 + $0x68] sm:$0xff] %vm1169_vm2, %v2219_v62  ;;  %s2608_s13 = scalar_lea.vmem %s2939_s4, %s2024_s26 }
  0x11   : > { %882 = vmatprep.subr.bf16.mxu0 %v2218_v1  ;;  %2028 = vmatprep.subr.bf16.mxu1 %v2218_v1  ;;  %v2098_v6 = vld [vmem:[%s2291_s5 + $0x4] ss:$8 sps:$4 sm:$0xff]   ;;  %v2096_v20 = vld [vmem:[%s2291_s5] ss:$8 sps:$4 sm:$0xff]   ;;  %v2102_v22 = vld [vmem:[%s2291_s5 + $0x14] ss:$8 sps:$4 sm:$0xff]  }
  0x12   : > { %1988 = vmatprep.mubr.msk.bf16.mxu0 %vm773_vm0, %v2098_v6  ;;  %v2101_v7 = vld [vmem:[%s2291_s5 + $0x104] ss:$8 sps:$4 sm:$0xff]   ;;  %v2099_v21 = vld [vmem:[%s2291_s5 + $0x100] ss:$8 sps:$4 sm:$0xff]   ;;  %v2104_v23 = vld [vmem:[%s2291_s5 + $0x114] ss:$8 sps:$4 sm:$0xff]  }
  0x13   : > { %2004 = vmatprep.mubr.msk.bf16.mxu1 %vm773_vm0, %v2101_v7  ;;  %v2106_v24 = vld [vmem:[%s2291_s5 + $0x10] ss:$8 sps:$4 sm:$0xff]   ;;  %v2108_v26 = vld [vmem:[%s2291_s5 + $0x24] ss:$8 sps:$4 sm:$0xff]   ;;  %v2112_v28 = vld [vmem:[%s2291_s5 + $0x20] ss:$8 sps:$4 sm:$0xff]  }
  0x14   : > { %883 = vmatpush1.bf16.msra.mxu0 %v2084_v4  ;;  %2043 = vmatpush1.bf16.msra.mxu1 %v2084_v4  ;;  %v2107_v25 = vld [vmem:[%s2291_s5 + $0x110] ss:$8 sps:$4 sm:$0xff]   ;;  %v2110_v27 = vld [vmem:[%s2291_s5 + $0x124] ss:$8 sps:$4 sm:$0xff]   ;;  %v2113_v29 = vld [vmem:[%s2291_s5 + $0x120] ss:$8 sps:$4 sm:$0xff]  }
  0x15   : > { %884 = vmatprep.subr.bf16.mxu0 %v2218_v1  ;;  %2029 = vmatprep.subr.bf16.mxu1 %v2218_v1  ;;  %v2114_v30 = vld [vmem:[%s2291_s5 + $0x34] ss:$8 sps:$4 sm:$0xff]   ;;  %v2118_v32 = vld [vmem:[%s2291_s5 + $0x30] ss:$8 sps:$4 sm:$0xff]   ;;  %v2120_v34 = vld [vmem:[%s2291_s5 + $0x44] ss:$8 sps:$4 sm:$0xff]  }
  0x16   : > { %v2116_v31 = vld [vmem:[%s2291_s5 + $0x134] ss:$8 sps:$4 sm:$0xff]   ;;  %v2119_v33 = vld [vmem:[%s2291_s5 + $0x130] ss:$8 sps:$4 sm:$0xff]   ;;  %v2122_v35 = vld [vmem:[%s2291_s5 + $0x144] ss:$8 sps:$4 sm:$0xff]  }
  0x17   : > { %v2124_v36 = vld [vmem:[%s2291_s5 + $0x40] ss:$8 sps:$4 sm:$0xff]   ;;  %v2126_v38 = vld [vmem:[%s2291_s5 + $0x54] ss:$8 sps:$4 sm:$0xff]   ;;  %v2130_v40 = vld [vmem:[%s2291_s5 + $0x50] ss:$8 sps:$4 sm:$0xff]  }
  0x18   : > { %885 = vmatpush1.bf16.msra.mxu0 %v2085_v5  ;;  %2044 = vmatpush1.bf16.msra.mxu1 %v2085_v5  ;;  %v2125_v37 = vld [vmem:[%s2291_s5 + $0x140] ss:$8 sps:$4 sm:$0xff]   ;;  %v2128_v39 = vld [vmem:[%s2291_s5 + $0x154] ss:$8 sps:$4 sm:$0xff]   ;;  %v2131_v41 = vld [vmem:[%s2291_s5 + $0x150] ss:$8 sps:$4 sm:$0xff]  }
  0x19   : > { %886 = vmatprep.subr.bf16.mxu0 %v2218_v1  ;;  %2030 = vmatprep.subr.bf16.mxu1 %v2218_v1  ;;  %v2132_v42 = vld [vmem:[%s2291_s5 + $0x64] ss:$8 sps:$4 sm:$0xff]   ;;  %v2136_v44 = vld [vmem:[%s2291_s5 + $0x60] ss:$8 sps:$4 sm:$0xff]   ;;  %v2138_v46 = vld [vmem:[%s2291_s5 + $0x74] ss:$8 sps:$4 sm:$0xff]  }
  0x1a   : > { %v2134_v43 = vld [vmem:[%s2291_s5 + $0x164] ss:$8 sps:$4 sm:$0xff]   ;;  %v2137_v45 = vld [vmem:[%s2291_s5 + $0x160] ss:$8 sps:$4 sm:$0xff]   ;;  %v2140_v47 = vld [vmem:[%s2291_s5 + $0x174] ss:$8 sps:$4 sm:$0xff]  }
  0x1b   : > { %v2142_v48 = vld [vmem:[%s2291_s5 + $0x70] ss:$8 sps:$4 sm:$0xff]   ;;  %v2144_v50 = vld [vmem:[%s2291_s5 + $0x84] ss:$8 sps:$4 sm:$0xff]   ;;  %v2148_v52 = vld [vmem:[%s2291_s5 + $0x80] ss:$8 sps:$4 sm:$0xff]  }
  0x1c   : > { %887 = vmatpush1.bf16.msra.mxu0 %v2086_v8  ;;  %2045 = vmatpush1.bf16.msra.mxu1 %v2086_v8  ;;  %v2143_v49 = vld [vmem:[%s2291_s5 + $0x170] ss:$8 sps:$4 sm:$0xff]   ;;  %v2146_v51 = vld [vmem:[%s2291_s5 + $0x184] ss:$8 sps:$4 sm:$0xff]   ;;  %v2149_v53 = vld [vmem:[%s2291_s5 + $0x180] ss:$8 sps:$4 sm:$0xff]  }
  0x1d   : > { %888 = vmatprep.subr.bf16.mxu0 %v2218_v1  ;;  %2031 = vmatprep.subr.bf16.mxu1 %v2218_v1  ;;  %v2150_v54 = vld [vmem:[%s2291_s5 + $0x94] ss:$8 sps:$4 sm:$0xff]   ;;  %v2154_v56 = vld [vmem:[%s2291_s5 + $0x90] ss:$8 sps:$4 sm:$0xff]   ;;  %v2156_v58 = vld [vmem:[%s2291_s5 + $0xa4] ss:$8 sps:$4 sm:$0xff]  }
  0x1e   : > { %v2152_v55 = vld [vmem:[%s2291_s5 + $0x194] ss:$8 sps:$4 sm:$0xff]   ;;  %v2155_v57 = vld [vmem:[%s2291_s5 + $0x190] ss:$8 sps:$4 sm:$0xff]   ;;  %v2158_v59 = vld [vmem:[%s2291_s5 + $0x1a4] ss:$8 sps:$4 sm:$0xff]  }
  0x1f   : > { %v2414_v60 = vld [vmem:[%s2291_s5 + $0xa0] ss:$8 sps:$4 sm:$0xff]   ;;  %1184 = vst.msk [vmem:[#allocation2 + $0x70] sm:$0xff] %vm1169_vm2, %v2219_v62  ;;  %1185 = vst.msk [vmem:[#allocation2 + $0x78] sm:$0xff] %vm1169_vm2, %v2219_v62  ;;  %v2162_v63 = vld [vmem:[%s2291_s5 + $0xb4] ss:$8 sps:$4 sm:$0xff]  }
  0x20   : > { %889 = vmatpush1.bf16.msra.mxu0 %v2087_v9  ;;  %2046 = vmatpush1.bf16.msra.mxu1 %v2087_v9  ;;  %v2417_v61 = vld [vmem:[%s2291_s5 + $0x1a0] ss:$8 sps:$4 sm:$0xff]   ;;  %1186 = vst.msk [vmem:[#allocation2 + $0x80] sm:$0xff] %vm1169_vm2, %v2219_v62  ;;  %1187 = vst.msk [vmem:[#allocation2 + $0x88] sm:$0xff] %vm1169_vm2, %v2219_v62  ;;  %v2164_v0 = vld [vmem:[%s2291_s5 + $0x1b4] ss:$8 sps:$4 sm:$0xff]  }
  0x21   : > { %890 = vmatprep.subr.bf16.mxu0 %v2218_v1  ;;  %2032 = vmatprep.subr.bf16.mxu1 %v2218_v1  ;;  %1188 = vst.msk [vmem:[#allocation2 + $0x90] sm:$0xff] %vm1169_vm2, %v2219_v62  ;;  %1189 = vst.msk [vmem:[#allocation2 + $0x98] sm:$0xff] %vm1169_vm2, %v2219_v62  ;;  %v2167_v2 = vld [vmem:[%s2291_s5 + $0x1b0] ss:$8 sps:$4 sm:$0xff]   ;;  %v2168_v3 = vld [vmem:[%s2291_s5 + $0xc4] ss:$8 sps:$4 sm:$0xff]  }
  0x22   : > { %1190 = vst.msk [vmem:[#allocation2 + $0xa0] sm:$0xff] %vm1169_vm2, %v2219_v62  ;;  %1191 = vst.msk [vmem:[#allocation2 + $0xa8] sm:$0xff] %vm1169_vm2, %v2219_v62  ;;  %v2170_v4 = vld [vmem:[%s2291_s5 + $0x1c4] ss:$8 sps:$4 sm:$0xff]   ;;  %v2172_v5 = vld [vmem:[%s2291_s5 + $0xc0] ss:$8 sps:$4 sm:$0xff]  }
  0x23   : > { %1192 = vst.msk [vmem:[#allocation2 + $0xb0] sm:$0xff] %vm1169_vm2, %v2219_v62  ;;  %1193 = vst.msk [vmem:[#allocation2 + $0xb8] sm:$0xff] %vm1169_vm2, %v2219_v62  ;;  %v2173_v6 = vld [vmem:[%s2291_s5 + $0x1c0] ss:$8 sps:$4 sm:$0xff]   ;;  %v2174_v7 = vld [vmem:[%s2291_s5 + $0xd4] ss:$8 sps:$4 sm:$0xff]  }
  0x24   : > { %891 = vmatpush1.bf16.msra.mxu0 %v2088_v10  ;;  %2047 = vmatpush1.bf16.msra.mxu1 %v2088_v10  ;;  %1194 = vst.msk [vmem:[#allocation2 + $0xc0] sm:$0xff] %vm1169_vm2, %v2219_v62  ;;  %1195 = vst.msk [vmem:[#allocation2 + $0xc8] sm:$0xff] %vm1169_vm2, %v2219_v62  ;;  %v2176_v8 = vld [vmem:[%s2291_s5 + $0x1d4] ss:$8 sps:$4 sm:$0xff]   ;;  %v2178_v9 = vld [vmem:[%s2291_s5 + $0xd0] ss:$8 sps:$4 sm:$0xff]  }
  0x25   : > { %892 = vmatprep.subr.bf16.mxu0 %v2218_v1  ;;  %2033 = vmatprep.subr.bf16.mxu1 %v2218_v1  ;;  %1196 = vst.msk [vmem:[#allocation2 + $0xd0] sm:$0xff] %vm1169_vm2, %v2219_v62  ;;  %1197 = vst.msk [vmem:[#allocation2 + $0xd8] sm:$0xff] %vm1169_vm2, %v2219_v62  ;;  %v2179_v10 = vld [vmem:[%s2291_s5 + $0x1d0] ss:$8 sps:$4 sm:$0xff]  }
  0x26   : > { %1198 = vst.msk [vmem:[#allocation2 + $0xe0] sm:$0xff] %vm1169_vm2, %v2219_v62  ;;  %1199 = vst.msk [vmem:[#allocation2 + $0xe8] sm:$0xff] %vm1169_vm2, %v2219_v62  ;;  %v2190_v17 = vld [vmem:[%s2291_s5 + $0xf0] ss:$8 sps:$4 sm:$0xff]  }
  0x27   : > { %1200 = vst.msk [vmem:[#allocation2 + $0xf0] sm:$0xff] %vm1169_vm2, %v2219_v62  ;;  %1201 = vst.msk [vmem:[#allocation2 + $0xf8] sm:$0xff] %vm1169_vm2, %v2219_v62  ;;  %v2191_v18 = vld [vmem:[%s2291_s5 + $0x1f0] ss:$8 sps:$4 sm:$0xff]  }
  0x28   : > { %893 = vmatpush1.bf16.msra.mxu0 %v2089_v11  ;;  %2048 = vmatpush1.bf16.msra.mxu1 %v2089_v11  ;;  %1202 = vst.msk [vmem:[#allocation2 + $0x100] sm:$0xff] %vm1169_vm2, %v2219_v62  ;;  %1203 = vst.msk [vmem:[#allocation2 + $0x108] sm:$0xff] %vm1169_vm2, %v2219_v62  ;;  %v2180_v11 = vld [vmem:[%s2291_s5 + $0xe4] ss:$8 sps:$4 sm:$0xff]  }
  0x29   : > { %894 = vmatprep.subr.bf16.mxu0 %v2218_v1  ;;  %2034 = vmatprep.subr.bf16.mxu1 %v2218_v1  ;;  %1204 = vst.msk [vmem:[#allocation2 + $0x110] sm:$0xff] %vm1169_vm2, %v2219_v62  ;;  %1205 = vst.msk [vmem:[#allocation2 + $0x118] sm:$0xff] %vm1169_vm2, %v2219_v62 }
  0x2a   : > { %1206 = vst.msk [vmem:[#allocation2 + $0x120] sm:$0xff] %vm1169_vm2, %v2219_v62  ;;  %1207 = vst.msk [vmem:[#allocation2 + $0x128] sm:$0xff] %vm1169_vm2, %v2219_v62 }
  0x2b   : > { %1208 = vst.msk [vmem:[#allocation2 + $0x130] sm:$0xff] %vm1169_vm2, %v2219_v62  ;;  %1209 = vst.msk [vmem:[#allocation2 + $0x138] sm:$0xff] %vm1169_vm2, %v2219_v62 }
  0x2c   : > { %895 = vmatpush1.bf16.msra.mxu0 %v2090_v12  ;;  %2049 = vmatpush1.bf16.msra.mxu1 %v2090_v12  ;;  %1210 = vst.msk [vmem:[#allocation2 + $0x140] sm:$0xff] %vm1169_vm2, %v2219_v62  ;;  %1211 = vst.msk [vmem:[#allocation2 + $0x148] sm:$0xff] %vm1169_vm2, %v2219_v62  ;;  %v2182_v12 = vld [vmem:[%s2291_s5 + $0x1e4] ss:$8 sps:$4 sm:$0xff]  }
  0x2d   : > { %896 = vmatprep.subr.bf16.mxu0 %v2218_v1  ;;  %2035 = vmatprep.subr.bf16.mxu1 %v2218_v1  ;;  %1212 = vst.msk [vmem:[#allocation2 + $0x150] sm:$0xff] %vm1169_vm2, %v2219_v62  ;;  %1213 = vst.msk [vmem:[#allocation2 + $0x158] sm:$0xff] %vm1169_vm2, %v2219_v62 }
  0x2e   : > { %1214 = vst.msk [vmem:[#allocation2 + $0x160] sm:$0xff] %vm1169_vm2, %v2219_v62  ;;  %1215 = vst.msk [vmem:[#allocation2 + $0x168] sm:$0xff] %vm1169_vm2, %v2219_v62 }
  0x2f   : > { %1216 = vst.msk [vmem:[#allocation2 + $0x170] sm:$0xff] %vm1169_vm2, %v2219_v62  ;;  %1217 = vst.msk [vmem:[#allocation2 + $0x178] sm:$0xff] %vm1169_vm2, %v2219_v62 }
  0x30   : > { %897 = vmatpush1.bf16.msra.mxu0 %v2091_v13  ;;  %2050 = vmatpush1.bf16.msra.mxu1 %v2091_v13  ;;  %1218 = vst.msk [vmem:[#allocation2 + $0x180] sm:$0xff] %vm1169_vm2, %v2219_v62  ;;  %1219 = vst.msk [vmem:[#allocation2 + $0x188] sm:$0xff] %vm1169_vm2, %v2219_v62  ;;  %v2184_v13 = vld [vmem:[%s2291_s5 + $0xe0] ss:$8 sps:$4 sm:$0xff]  }
  0x31   : > { %898 = vmatprep.subr.bf16.mxu0 %v2218_v1  ;;  %2036 = vmatprep.subr.bf16.mxu1 %v2218_v1  ;;  %1220 = vst.msk [vmem:[#allocation2 + $0x190] sm:$0xff] %vm1169_vm2, %v2219_v62  ;;  %1221 = vst.msk [vmem:[#allocation2 + $0x198] sm:$0xff] %vm1169_vm2, %v2219_v62 }
  0x32   : > { %1222 = vst.msk [vmem:[#allocation2 + $0x1a0] sm:$0xff] %vm1169_vm2, %v2219_v62  ;;  %1223 = vst.msk [vmem:[#allocation2 + $0x1a8] sm:$0xff] %vm1169_vm2, %v2219_v62 }
  0x33   : > { %1224 = vst.msk [vmem:[#allocation2 + $0x1b0] sm:$0xff] %vm1169_vm2, %v2219_v62  ;;  %1225 = vst.msk [vmem:[#allocation2 + $0x1b8] sm:$0xff] %vm1169_vm2, %v2219_v62 }
  0x34   : > { %899 = vmatpush1.bf16.msra.mxu0 %v2092_v14  ;;  %2051 = vmatpush1.bf16.msra.mxu1 %v2092_v14  ;;  %1226 = vst.msk [vmem:[#allocation2 + $0x1c0] sm:$0xff] %vm1169_vm2, %v2219_v62  ;;  %1227 = vst.msk [vmem:[#allocation2 + $0x1c8] sm:$0xff] %vm1169_vm2, %v2219_v62  ;;  %v2185_v14 = vld [vmem:[%s2291_s5 + $0x1e0] ss:$8 sps:$4 sm:$0xff]  }
  0x35   : > { %900 = vmatprep.subr.bf16.mxu0 %v2218_v1  ;;  %2037 = vmatprep.subr.bf16.mxu1 %v2218_v1  ;;  %1228 = vst.msk [vmem:[#allocation2 + $0x1d0] sm:$0xff] %vm1169_vm2, %v2219_v62  ;;  %1229 = vst.msk [vmem:[#allocation2 + $0x1d8] sm:$0xff] %vm1169_vm2, %v2219_v62 }
  0x36   : > { %1230 = vst.msk [vmem:[#allocation2 + $0x1e0] sm:$0xff] %vm1169_vm2, %v2219_v62  ;;  %1231 = vst.msk [vmem:[#allocation2 + $0x1e8] sm:$0xff] %vm1169_vm2, %v2219_v62 }
  0x37   : > { %1232 = vst.msk [vmem:[#allocation2 + $0x1f0] sm:$0xff] %vm1169_vm2, %v2219_v62  ;;  %1233 = vst.msk [vmem:[#allocation2 + $0x1f8] sm:$0xff] %vm1169_vm2, %v2219_v62 }
  0x38   : > { %901 = vmatpush1.bf16.msra.mxu0 %v2093_v15  ;;  %2052 = vmatpush1.bf16.msra.mxu1 %v2093_v15  ;;  %v2186_v15 = vld [vmem:[%s2291_s5 + $0xf4] ss:$8 sps:$4 sm:$0xff]  }
  0x39   : > { %902 = vmatprep.subr.bf16.mxu0 %v2218_v1  ;;  %2038 = vmatprep.subr.bf16.mxu1 %v2218_v1 }
  0x3c   : > { %903 = vmatpush1.bf16.msra.mxu0 %v2094_v16  ;;  %2053 = vmatpush1.bf16.msra.mxu1 %v2094_v16  ;;  %v2188_v16 = vld [vmem:[%s2291_s5 + $0x1f4] ss:$8 sps:$4 sm:$0xff]  }
  0x3d   : > { %904 = vmatprep.subr.bf16.mxu0 %v2218_v1  ;;  %2039 = vmatprep.subr.bf16.mxu1 %v2218_v1  ;;  %v2166_v1 = vld [vmem:[%s2291_s5 + $0xb0] ss:$8 sps:$4 sm:$0xff]  }
  0x40   : > { %905 = vmatpush1.bf16.msra.mxu0 %v874_v19  ;;  %2054 = vmatpush1.bf16.msra.mxu1 %v874_v19  ;;  %v1234_v19 = vld [vmem:[#allocation2] sm:$0xff] }
  0x43   : > { %909 = vmatmul.mubr.bf16.vlgmr.msra.gmra.mrb[0].mxu0 %v2096_v20  ;;  %1037 = vmatmul.mubr.bf16.vlgmr.msra.gmra.mrb[0].mxu1 %v2099_v21  ;;  %v1266_v20 = vld [vmem:[#allocation2 + $0x100] sm:$0xff] }
  0x44   : > { %1989 = vmatprep.mubr.msk.bf16.mxu0 %vm773_vm0, %v2102_v22  ;;  %2005 = vmatprep.mubr.msk.bf16.mxu1 %vm773_vm0, %v2104_v23  ;;  %v1235_v23 = vld [vmem:[#allocation2 + $0x8] sm:$0xff] }
  0x4b   : > { %917 = vmatmul.mubr.bf16.gmra.mrb[4].mxu0 %v2106_v24  ;;  %1045 = vmatmul.mubr.bf16.gmra.mrb[4].mxu1 %v2107_v25  ;;  %v1267_v24 = vld [vmem:[#allocation2 + $0x108] sm:$0xff] }
  0x4c   : > { %1990 = vmatprep.mubr.msk.bf16.mxu0 %vm773_vm0, %v2108_v26  ;;  %2006 = vmatprep.mubr.msk.bf16.mxu1 %vm773_vm0, %v2110_v27 }
  0x53   : > { %925 = vmatmul.mubr.bf16.gmra.mrb[8].mxu0 %v2112_v28  ;;  %1053 = vmatmul.mubr.bf16.gmra.mrb[8].mxu1 %v2113_v29 }
  0x54   : > { %1991 = vmatprep.mubr.msk.bf16.mxu0 %vm773_vm0, %v2114_v30  ;;  %2007 = vmatprep.mubr.msk.bf16.mxu1 %vm773_vm0, %v2116_v31 }
  0x5b   : > { %933 = vmatmul.mubr.bf16.gmra.mrb[12].mxu0 %v2118_v32  ;;  %1061 = vmatmul.mubr.bf16.gmra.mrb[12].mxu1 %v2119_v33 }
  0x5c   : > { %1992 = vmatprep.mubr.msk.bf16.mxu0 %vm773_vm0, %v2120_v34  ;;  %2008 = vmatprep.mubr.msk.bf16.mxu1 %vm773_vm0, %v2122_v35  ;;  %v1236_v35 = vld [vmem:[#allocation2 + $0x10] sm:$0xff] }
  0x63   : > { %941 = vmatmul.mubr.bf16.gmra.mrb[16].mxu0 %v2124_v36  ;;  %1069 = vmatmul.mubr.bf16.gmra.mrb[16].mxu1 %v2125_v37  ;;  %v1268_v36 = vld [vmem:[#allocation2 + $0x110] sm:$0xff]  ;;  %v2586_v37 = vld [vmem:[%s2937_s2] ss:$0 sm:$0xff] }
  0x64   : > { %1993 = vmatprep.mubr.msk.bf16.mxu0 %vm773_vm0, %v2126_v38  ;;  %2009 = vmatprep.mubr.msk.bf16.mxu1 %vm773_vm0, %v2128_v39 }
  0x6b   : > { %949 = vmatmul.mubr.bf16.gmra.mrb[20].mxu0 %v2130_v40  ;;  %1077 = vmatmul.mubr.bf16.gmra.mrb[20].mxu1 %v2131_v41  ;;  %v1237_v40 = vld [vmem:[#allocation2 + $0x18] sm:$0xff] }
  0x6c   : > { %1994 = vmatprep.mubr.msk.bf16.mxu0 %vm773_vm0, %v2132_v42  ;;  %2010 = vmatprep.mubr.msk.bf16.mxu1 %vm773_vm0, %v2134_v43  ;;  %v1269_v41 = vld [vmem:[#allocation2 + $0x118] sm:$0xff] }
  0x73   : > { %957 = vmatmul.mubr.bf16.gmra.mrb[24].mxu0 %v2136_v44  ;;  %1085 = vmatmul.mubr.bf16.gmra.mrb[24].mxu1 %v2137_v45 }
  0x74   : > { %1995 = vmatprep.mubr.msk.bf16.mxu0 %vm773_vm0, %v2138_v46  ;;  %2011 = vmatprep.mubr.msk.bf16.mxu1 %vm773_vm0, %v2140_v47  ;;  %v2591_v47 = vld [vmem:[%s2938_s3] ss:$0 sm:$0xff] }
  0x7b   : > { %965 = vmatmul.mubr.bf16.gmra.mrb[28].mxu0 %v2142_v48  ;;  %1093 = vmatmul.mubr.bf16.gmra.mrb[28].mxu1 %v2143_v49 }
  0x7c   : > { %1996 = vmatprep.mubr.msk.bf16.mxu0 %vm773_vm0, %v2144_v50  ;;  %2012 = vmatprep.mubr.msk.bf16.mxu1 %vm773_vm0, %v2146_v51 }
  0x83   : > { %973 = vmatmul.mubr.bf16.gmra.mrb[32].mxu0 %v2148_v52  ;;  %1101 = vmatmul.mubr.bf16.gmra.mrb[32].mxu1 %v2149_v53 }
  0x84   : > { %1997 = vmatprep.mubr.msk.bf16.mxu0 %vm773_vm0, %v2150_v54  ;;  %2013 = vmatprep.mubr.msk.bf16.mxu1 %vm773_vm0, %v2152_v55 }
  0x8b   : > { %981 = vmatmul.mubr.bf16.gmra.mrb[36].mxu0 %v2154_v56  ;;  %1109 = vmatmul.mubr.bf16.gmra.mrb[36].mxu1 %v2155_v57 }
  0x8c   : > { %1998 = vmatprep.mubr.msk.bf16.mxu0 %vm773_vm0, %v2156_v58  ;;  %2014 = vmatprep.mubr.msk.bf16.mxu1 %vm773_vm0, %v2158_v59 }
  0x93   : > { %989 = vmatmul.mubr.bf16.gmra.mrb[40].mxu0 %v2414_v60  ;;  %1117 = vmatmul.mubr.bf16.gmra.mrb[40].mxu1 %v2417_v61 }
  0x94   : > { %1999 = vmatprep.mubr.msk.bf16.mxu0 %vm773_vm0, %v2162_v63  ;;  %2015 = vmatprep.mubr.msk.bf16.mxu1 %vm773_vm0, %v2164_v0  ;;  %v1238_v63 = vld [vmem:[#allocation2 + $0x20] sm:$0xff] }
  0x95   : > { %v1270_v0 = vld [vmem:[#allocation2 + $0x120] sm:$0xff] }
  0x9b   : > { %997 = vmatmul.mubr.bf16.gmra.mrb[44].mxu0 %v2166_v1  ;;  %1125 = vmatmul.mubr.bf16.gmra.mrb[44].mxu1 %v2167_v2 }
  0x9c   : > { %2000 = vmatprep.mubr.msk.bf16.mxu0 %vm773_vm0, %v2168_v3  ;;  %2016 = vmatprep.mubr.msk.bf16.mxu1 %vm773_vm0, %v2170_v4 }
  0xa3   : > { %1005 = vmatmul.mubr.bf16.gmra.mrb[48].mxu0 %v2172_v5  ;;  %1133 = vmatmul.mubr.bf16.gmra.mrb[48].mxu1 %v2173_v6 }
  0xa4   : > { %2001 = vmatprep.mubr.msk.bf16.mxu0 %vm773_vm0, %v2174_v7  ;;  %2017 = vmatprep.mubr.msk.bf16.mxu1 %vm773_vm0, %v2176_v8  ;;  %v1239_v7 = vld [vmem:[#allocation2 + $0x28] sm:$0xff] }
  0xa5   : > { %v1271_v8 = vld [vmem:[#allocation2 + $0x128] sm:$0xff] }
  0xab   : > { %1013 = vmatmul.mubr.bf16.gmra.mrb[52].mxu0 %v2178_v9  ;;  %1141 = vmatmul.mubr.bf16.gmra.mrb[52].mxu1 %v2179_v10 }
  0xac   : > { %2002 = vmatprep.mubr.msk.bf16.mxu0 %vm773_vm0, %v2180_v11  ;;  %2018 = vmatprep.mubr.msk.bf16.mxu1 %vm773_vm0, %v2182_v12 }
  0xb3   : > { %1021 = vmatmul.mubr.bf16.gmra.mrb[56].mxu0 %v2184_v13  ;;  %1149 = vmatmul.mubr.bf16.gmra.mrb[56].mxu1 %v2185_v14 }
  0xb4   : > { %2003 = vmatprep.mubr.msk.bf16.mxu0 %vm773_vm0, %v2186_v15  ;;  %2019 = vmatprep.mubr.msk.bf16.mxu1 %vm773_vm0, %v2188_v16 }
  0xbb   : > { %1029 = vmatmul.mubr.bf16.gmra.mrb[60].mxu0 %v2190_v17  ;;  %1157 = vmatmul.mubr.bf16.gmra.mrb[60].mxu1 %v2191_v18 }
 0x116   : > { %v910_v21 = vpop.f32.mrb[0].mxu0  ;;  %v1038_v22 = vpop.f32.mrb[0].mxu1 }
 0x117   : > { %v1298_v25 = vadd.f32 %v1234_v19, %v910_v21  ;;  %v1330_v26 = vadd.f32 %v1266_v20, %v1038_v22  ;;  %v912_v27 = vpop.f32.mrb[1].mxu0  ;;  %v1040_v28 = vpop.f32.mrb[1].mxu1 }
 0x118   : > { %v913_v29 = vpop.f32.mrb[2].mxu0  ;;  %v1041_v30 = vpop.f32.mrb[2].mxu1 }
 0x119   : > { %1363 = vst.msk [vmem:[#allocation2] sm:$0xff] %vm1169_vm2, %v1298_v25  ;;  %1395 = vst.msk [vmem:[#allocation2 + $0x100] sm:$0xff] %vm1169_vm2, %v1330_v26  ;;  %v1299_v31 = vadd.f32 %v1235_v23, %v913_v29  ;;  %v1331_v32 = vadd.f32 %v1267_v24, %v1041_v30  ;;  %v915_v33 = vpop.f32.mrb[3].mxu0  ;;  %v1043_v34 = vpop.f32.mrb[3].mxu1 }
 0x11b   : > { %1364 = vst.msk [vmem:[#allocation2 + $0x8] sm:$0xff] %vm1169_vm2, %v1299_v31  ;;  %1396 = vst.msk [vmem:[#allocation2 + $0x108] sm:$0xff] %vm1169_vm2, %v1331_v32  ;;  %v1240_v31 = vld [vmem:[#allocation2 + $0x30] sm:$0xff] }
 0x11c   : > { %v1272_v32 = vld [vmem:[#allocation2 + $0x130] sm:$0xff] }
 0x11e   : > { %v918_v38 = vpop.f32.mrb[4].mxu0  ;;  %v1046_v39 = vpop.f32.mrb[4].mxu1 }
 0x11f   : > { %v1300_v42 = vadd.f32 %v1236_v35, %v918_v38  ;;  %v1332_v43 = vadd.f32 %v1268_v36, %v1046_v39  ;;  %v920_v44 = vpop.f32.mrb[5].mxu0  ;;  %v1048_v45 = vpop.f32.mrb[5].mxu1 }
 0x120   : > { %v1430_v46 = vld [vmem:[#allocation2] sm:$0xff]  ;;  %v921_v49 = vpop.f32.mrb[6].mxu0  ;;  %v1049_v50 = vpop.f32.mrb[6].mxu1 }
 0x121   : > { %v1462_v48 = vld [vmem:[#allocation2 + $0x100] sm:$0xff]  ;;  %v1501_v51 = vmul.f32 %v2586_v37, %v1430_v46  ;;  %1365 = vst.msk [vmem:[#allocation2 + $0x10] sm:$0xff] %vm1169_vm2, %v1300_v42  ;;  %1397 = vst.msk [vmem:[#allocation2 + $0x110] sm:$0xff] %vm1169_vm2, %v1332_v43  ;;  %v1301_v53 = vadd.f32 %v1237_v40, %v921_v49  ;;  %v1333_v54 = vadd.f32 %v1269_v41, %v1049_v50  ;;  %v923_v55 = vpop.f32.mrb[7].mxu0  ;;  %v1051_v56 = vpop.f32.mrb[7].mxu1  ;;  %v1241_v40 = vld [vmem:[#allocation2 + $0x38] sm:$0xff] }
 0x122   : > { %v1533_v52 = vmul.f32 %v2586_v37, %v1462_v48  ;;  %v1431_v57 = vld [vmem:[#allocation2 + $0x8] sm:$0xff]  ;;  %v1273_v41 = vld [vmem:[#allocation2 + $0x138] sm:$0xff] }
 0x123   : > { %v1463_v58 = vld [vmem:[#allocation2 + $0x108] sm:$0xff]  ;;  %v1572_v59 = vadd.f32 %v2591_v47, %v1501_v51  ;;  %v1502_v61 = vmul.f32 %v2586_v37, %v1431_v57  ;;  %1366 = vst.msk [vmem:[#allocation2 + $0x18] sm:$0xff] %vm1169_vm2, %v1301_v53  ;;  %1398 = vst.msk [vmem:[#allocation2 + $0x118] sm:$0xff] %vm1169_vm2, %v1333_v54 }
 0x124   : > { %v1604_v60 = vadd.f32 %v2591_v47, %v1533_v52  ;;  %v1534_v62 = vmul.f32 %v2586_v37, %v1463_v58 }
 0x125   : > { %v1636_v1 = vmax.f32 %v1572_v59, 0.0  ;;  %v1573_v3 = vadd.f32 %v2591_v47, %v1502_v61 }
 0x126   : > { %v1668_v2 = vmax.f32 %v1604_v60, 0.0  ;;  %v1605_v4 = vadd.f32 %v2591_v47, %v1534_v62  ;;  %v926_v5 = vpop.f32.mrb[8].mxu0  ;;  %v1054_v6 = vpop.f32.mrb[8].mxu1 }
 0x127   : > { %1700 = vst.msk [vmem:[%s2608_s13] sm:$0xff] %vm1169_vm2, %v1636_v1  ;;  %v1637_v9 = vmax.f32 %v1573_v3, 0.0  ;;  %v1302_v11 = vadd.f32 %v1238_v63, %v926_v5  ;;  %v1334_v12 = vadd.f32 %v1270_v0, %v1054_v6  ;;  %v928_v13 = vpop.f32.mrb[9].mxu0  ;;  %v1056_v14 = vpop.f32.mrb[9].mxu1  ;;  %v1242_v1 = vld [vmem:[#allocation2 + $0x40] sm:$0xff] }
 0x128   : > { %1732 = vst.msk [vmem:[%s2608_s13 + $0x100] sm:$0xff] %vm1169_vm2, %v1668_v2  ;;  %v1669_v10 = vmax.f32 %v1605_v4, 0.0  ;;  %v1432_v15 = vld [vmem:[#allocation2 + $0x10] sm:$0xff]  ;;  %v929_v17 = vpop.f32.mrb[10].mxu0  ;;  %v1057_v18 = vpop.f32.mrb[10].mxu1  ;;  %v1274_v2 = vld [vmem:[#allocation2 + $0x140] sm:$0xff] }
 0x129   : > { %v1464_v16 = vld [vmem:[#allocation2 + $0x110] sm:$0xff]  ;;  %1701 = vst.msk [vmem:[%s2608_s13 + $0x8] sm:$0xff] %vm1169_vm2, %v1637_v9  ;;  %v1503_v19 = vmul.f32 %v2586_v37, %v1432_v15  ;;  %1367 = vst.msk [vmem:[#allocation2 + $0x20] sm:$0xff] %vm1169_vm2, %v1302_v11  ;;  %v1303_v21 = vadd.f32 %v1239_v7, %v929_v17  ;;  %v1335_v22 = vadd.f32 %v1271_v8, %v1057_v18  ;;  %v931_v23 = vpop.f32.mrb[11].mxu0  ;;  %v1059_v24 = vpop.f32.mrb[11].mxu1  ;;  %v1243_v9 = vld [vmem:[#allocation2 + $0x48] sm:$0xff] }
 0x12a   : > { %1733 = vst.msk [vmem:[%s2608_s13 + $0x108] sm:$0xff] %vm1169_vm2, %v1669_v10  ;;  %v1535_v20 = vmul.f32 %v2586_v37, %v1464_v16  ;;  %1399 = vst.msk [vmem:[#allocation2 + $0x120] sm:$0xff] %vm1169_vm2, %v1334_v12  ;;  %v1433_v25 = vld [vmem:[#allocation2 + $0x18] sm:$0xff]  ;;  %v1275_v10 = vld [vmem:[#allocation2 + $0x148] sm:$0xff] }
 0x12b   : > { %v1465_v26 = vld [vmem:[#allocation2 + $0x118] sm:$0xff]  ;;  %v1574_v27 = vadd.f32 %v2591_v47, %v1503_v19  ;;  %v1504_v29 = vmul.f32 %v2586_v37, %v1433_v25  ;;  %1368 = vst.msk [vmem:[#allocation2 + $0x28] sm:$0xff] %vm1169_vm2, %v1303_v21  ;;  %1400 = vst.msk [vmem:[#allocation2 + $0x128] sm:$0xff] %vm1169_vm2, %v1335_v22 }
 0x12c   : > { %v1606_v28 = vadd.f32 %v2591_v47, %v1535_v20  ;;  %v1536_v30 = vmul.f32 %v2586_v37, %v1465_v26 }
 0x12d   : > { %v1638_v33 = vmax.f32 %v1574_v27, 0.0  ;;  %v1575_v35 = vadd.f32 %v2591_v47, %v1504_v29 }
 0x12e   : > { %v1670_v34 = vmax.f32 %v1606_v28, 0.0  ;;  %v1607_v36 = vadd.f32 %v2591_v47, %v1536_v30  ;;  %v934_v38 = vpop.f32.mrb[12].mxu0  ;;  %v1062_v39 = vpop.f32.mrb[12].mxu1 }
 0x12f   : > { %1702 = vst.msk [vmem:[%s2608_s13 + $0x10] sm:$0xff] %vm1169_vm2, %v1638_v33  ;;  %v1639_v42 = vmax.f32 %v1575_v35, 0.0  ;;  %v1304_v44 = vadd.f32 %v1240_v31, %v934_v38  ;;  %v1336_v45 = vadd.f32 %v1272_v32, %v1062_v39  ;;  %v936_v46 = vpop.f32.mrb[13].mxu0  ;;  %v1064_v48 = vpop.f32.mrb[13].mxu1  ;;  %v1244_v33 = vld [vmem:[#allocation2 + $0x50] sm:$0xff] }
 0x130   : > { %1734 = vst.msk [vmem:[%s2608_s13 + $0x110] sm:$0xff] %vm1169_vm2, %v1670_v34  ;;  %v1671_v43 = vmax.f32 %v1607_v36, 0.0  ;;  %v1434_v49 = vld [vmem:[#allocation2 + $0x20] sm:$0xff]  ;;  %v937_v51 = vpop.f32.mrb[14].mxu0  ;;  %v1065_v52 = vpop.f32.mrb[14].mxu1  ;;  %v1276_v34 = vld [vmem:[#allocation2 + $0x150] sm:$0xff] }
 0x131   : > { %v1466_v50 = vld [vmem:[#allocation2 + $0x120] sm:$0xff]  ;;  %1703 = vst.msk [vmem:[%s2608_s13 + $0x18] sm:$0xff] %vm1169_vm2, %v1639_v42  ;;  %v1505_v53 = vmul.f32 %v2586_v37, %v1434_v49  ;;  %1369 = vst.msk [vmem:[#allocation2 + $0x30] sm:$0xff] %vm1169_vm2, %v1304_v44  ;;  %v1305_v55 = vadd.f32 %v1241_v40, %v937_v51  ;;  %v1337_v56 = vadd.f32 %v1273_v41, %v1065_v52  ;;  %v939_v57 = vpop.f32.mrb[15].mxu0  ;;  %v1067_v58 = vpop.f32.mrb[15].mxu1  ;;  %v1245_v42 = vld [vmem:[#allocation2 + $0x58] sm:$0xff] }
 0x132   : > { %1735 = vst.msk [vmem:[%s2608_s13 + $0x118] sm:$0xff] %vm1169_vm2, %v1671_v43  ;;  %v1537_v54 = vmul.f32 %v2586_v37, %v1466_v50  ;;  %1401 = vst.msk [vmem:[#allocation2 + $0x130] sm:$0xff] %vm1169_vm2, %v1336_v45  ;;  %v1435_v59 = vld [vmem:[#allocation2 + $0x28] sm:$0xff]  ;;  %v1277_v43 = vld [vmem:[#allocation2 + $0x158] sm:$0xff] }
 0x133   : > { %v1467_v60 = vld [vmem:[#allocation2 + $0x128] sm:$0xff]  ;;  %v1576_v61 = vadd.f32 %v2591_v47, %v1505_v53  ;;  %v1506_v63 = vmul.f32 %v2586_v37, %v1435_v59  ;;  %1370 = vst.msk [vmem:[#allocation2 + $0x38] sm:$0xff] %vm1169_vm2, %v1305_v55  ;;  %1402 = vst.msk [vmem:[#allocation2 + $0x138] sm:$0xff] %vm1169_vm2, %v1337_v56 }
 0x134   : > { %v1608_v62 = vadd.f32 %v2591_v47, %v1537_v54  ;;  %v1538_v0 = vmul.f32 %v2586_v37, %v1467_v60 }
 0x135   : > { %v1640_v3 = vmax.f32 %v1576_v61, 0.0  ;;  %v1577_v5 = vadd.f32 %v2591_v47, %v1506_v63 }
 0x136   : > { %v1672_v4 = vmax.f32 %v1608_v62, 0.0  ;;  %v1609_v6 = vadd.f32 %v2591_v47, %v1538_v0  ;;  %v942_v7 = vpop.f32.mrb[16].mxu0  ;;  %v1070_v8 = vpop.f32.mrb[16].mxu1 }
 0x137   : > { %1704 = vst.msk [vmem:[%s2608_s13 + $0x20] sm:$0xff] %vm1169_vm2, %v1640_v3  ;;  %v1641_v11 = vmax.f32 %v1577_v5, 0.0  ;;  %v1306_v13 = vadd.f32 %v1242_v1, %v942_v7  ;;  %v1338_v14 = vadd.f32 %v1274_v2, %v1070_v8  ;;  %v944_v15 = vpop.f32.mrb[17].mxu0  ;;  %v1072_v16 = vpop.f32.mrb[17].mxu1  ;;  %v1246_v3 = vld [vmem:[#allocation2 + $0x60] sm:$0xff] }
 0x138   : > { %1736 = vst.msk [vmem:[%s2608_s13 + $0x120] sm:$0xff] %vm1169_vm2, %v1672_v4  ;;  %v1673_v12 = vmax.f32 %v1609_v6, 0.0  ;;  %v1436_v17 = vld [vmem:[#allocation2 + $0x30] sm:$0xff]  ;;  %v945_v19 = vpop.f32.mrb[18].mxu0  ;;  %v1073_v20 = vpop.f32.mrb[18].mxu1  ;;  %v1278_v4 = vld [vmem:[#allocation2 + $0x160] sm:$0xff] }
 0x139   : > { %v1468_v18 = vld [vmem:[#allocation2 + $0x130] sm:$0xff]  ;;  %1705 = vst.msk [vmem:[%s2608_s13 + $0x28] sm:$0xff] %vm1169_vm2, %v1641_v11  ;;  %v1507_v21 = vmul.f32 %v2586_v37, %v1436_v17  ;;  %1371 = vst.msk [vmem:[#allocation2 + $0x40] sm:$0xff] %vm1169_vm2, %v1306_v13  ;;  %v1307_v23 = vadd.f32 %v1243_v9, %v945_v19  ;;  %v1339_v24 = vadd.f32 %v1275_v10, %v1073_v20  ;;  %v947_v25 = vpop.f32.mrb[19].mxu0  ;;  %v1075_v26 = vpop.f32.mrb[19].mxu1  ;;  %v1247_v11 = vld [vmem:[#allocation2 + $0x68] sm:$0xff] }
 0x13a   : > { %1737 = vst.msk [vmem:[%s2608_s13 + $0x128] sm:$0xff] %vm1169_vm2, %v1673_v12  ;;  %v1539_v22 = vmul.f32 %v2586_v37, %v1468_v18  ;;  %1403 = vst.msk [vmem:[#allocation2 + $0x140] sm:$0xff] %vm1169_vm2, %v1338_v14  ;;  %v1437_v27 = vld [vmem:[#allocation2 + $0x38] sm:$0xff]  ;;  %v1279_v12 = vld [vmem:[#allocation2 + $0x168] sm:$0xff] }
 0x13b   : > { %v1469_v28 = vld [vmem:[#allocation2 + $0x138] sm:$0xff]  ;;  %v1578_v29 = vadd.f32 %v2591_v47, %v1507_v21  ;;  %v1508_v31 = vmul.f32 %v2586_v37, %v1437_v27  ;;  %1372 = vst.msk [vmem:[#allocation2 + $0x48] sm:$0xff] %vm1169_vm2, %v1307_v23  ;;  %1404 = vst.msk [vmem:[#allocation2 + $0x148] sm:$0xff] %vm1169_vm2, %v1339_v24 }
 0x13c   : > { %v1610_v30 = vadd.f32 %v2591_v47, %v1539_v22  ;;  %v1540_v32 = vmul.f32 %v2586_v37, %v1469_v28 }
 0x13d   : > { %v1642_v35 = vmax.f32 %v1578_v29, 0.0  ;;  %v1579_v38 = vadd.f32 %v2591_v47, %v1508_v31 }
 0x13e   : > { %v1674_v36 = vmax.f32 %v1610_v30, 0.0  ;;  %v1611_v39 = vadd.f32 %v2591_v47, %v1540_v32  ;;  %v950_v40 = vpop.f32.mrb[20].mxu0  ;;  %v1078_v41 = vpop.f32.mrb[20].mxu1 }
 0x13f   : > { %1706 = vst.msk [vmem:[%s2608_s13 + $0x30] sm:$0xff] %vm1169_vm2, %v1642_v35  ;;  %v1643_v44 = vmax.f32 %v1579_v38, 0.0  ;;  %v1308_v46 = vadd.f32 %v1244_v33, %v950_v40  ;;  %v1340_v48 = vadd.f32 %v1276_v34, %v1078_v41  ;;  %v952_v49 = vpop.f32.mrb[21].mxu0  ;;  %v1080_v50 = vpop.f32.mrb[21].mxu1  ;;  %v1248_v35 = vld [vmem:[#allocation2 + $0x70] sm:$0xff] }
 0x140   : > { %1738 = vst.msk [vmem:[%s2608_s13 + $0x130] sm:$0xff] %vm1169_vm2, %v1674_v36  ;;  %v1675_v45 = vmax.f32 %v1611_v39, 0.0  ;;  %v1438_v51 = vld [vmem:[#allocation2 + $0x40] sm:$0xff]  ;;  %v953_v53 = vpop.f32.mrb[22].mxu0  ;;  %v1081_v54 = vpop.f32.mrb[22].mxu1  ;;  %v1280_v36 = vld [vmem:[#allocation2 + $0x170] sm:$0xff] }
 0x141   : > { %v1470_v52 = vld [vmem:[#allocation2 + $0x140] sm:$0xff]  ;;  %1707 = vst.msk [vmem:[%s2608_s13 + $0x38] sm:$0xff] %vm1169_vm2, %v1643_v44  ;;  %v1509_v55 = vmul.f32 %v2586_v37, %v1438_v51  ;;  %1373 = vst.msk [vmem:[#allocation2 + $0x50] sm:$0xff] %vm1169_vm2, %v1308_v46  ;;  %v1309_v57 = vadd.f32 %v1245_v42, %v953_v53  ;;  %v1341_v58 = vadd.f32 %v1277_v43, %v1081_v54  ;;  %v955_v59 = vpop.f32.mrb[23].mxu0  ;;  %v1083_v60 = vpop.f32.mrb[23].mxu1  ;;  %v1249_v44 = vld [vmem:[#allocation2 + $0x78] sm:$0xff] }
 0x142   : > { %1739 = vst.msk [vmem:[%s2608_s13 + $0x138] sm:$0xff] %vm1169_vm2, %v1675_v45  ;;  %v1541_v56 = vmul.f32 %v2586_v37, %v1470_v52  ;;  %1405 = vst.msk [vmem:[#allocation2 + $0x150] sm:$0xff] %vm1169_vm2, %v1340_v48  ;;  %v1439_v61 = vld [vmem:[#allocation2 + $0x48] sm:$0xff]  ;;  %v1281_v45 = vld [vmem:[#allocation2 + $0x178] sm:$0xff] }
 0x143   : > { %v1471_v62 = vld [vmem:[#allocation2 + $0x148] sm:$0xff]  ;;  %v1580_v63 = vadd.f32 %v2591_v47, %v1509_v55  ;;  %v1510_v1 = vmul.f32 %v2586_v37, %v1439_v61  ;;  %1374 = vst.msk [vmem:[#allocation2 + $0x58] sm:$0xff] %vm1169_vm2, %v1309_v57  ;;  %1406 = vst.msk [vmem:[#allocation2 + $0x158] sm:$0xff] %vm1169_vm2, %v1341_v58 }
 0x144   : > { %v1612_v0 = vadd.f32 %v2591_v47, %v1541_v56  ;;  %v1542_v2 = vmul.f32 %v2586_v37, %v1471_v62 }
 0x145   : > { %v1644_v5 = vmax.f32 %v1580_v63, 0.0  ;;  %v1581_v7 = vadd.f32 %v2591_v47, %v1510_v1 }
 0x146   : > { %v1676_v6 = vmax.f32 %v1612_v0, 0.0  ;;  %v1613_v8 = vadd.f32 %v2591_v47, %v1542_v2  ;;  %v958_v9 = vpop.f32.mrb[24].mxu0  ;;  %v1086_v10 = vpop.f32.mrb[24].mxu1 }
 0x147   : > { %1708 = vst.msk [vmem:[%s2608_s13 + $0x40] sm:$0xff] %vm1169_vm2, %v1644_v5  ;;  %v1645_v13 = vmax.f32 %v1581_v7, 0.0  ;;  %v1310_v15 = vadd.f32 %v1246_v3, %v958_v9  ;;  %v1342_v16 = vadd.f32 %v1278_v4, %v1086_v10  ;;  %v960_v17 = vpop.f32.mrb[25].mxu0  ;;  %v1088_v18 = vpop.f32.mrb[25].mxu1  ;;  %v1250_v5 = vld [vmem:[#allocation2 + $0x80] sm:$0xff] }
 0x148   : > { %1740 = vst.msk [vmem:[%s2608_s13 + $0x140] sm:$0xff] %vm1169_vm2, %v1676_v6  ;;  %v1677_v14 = vmax.f32 %v1613_v8, 0.0  ;;  %v1440_v19 = vld [vmem:[#allocation2 + $0x50] sm:$0xff]  ;;  %v961_v21 = vpop.f32.mrb[26].mxu0  ;;  %v1089_v22 = vpop.f32.mrb[26].mxu1  ;;  %v1282_v6 = vld [vmem:[#allocation2 + $0x180] sm:$0xff] }
 0x149   : > { %v1472_v20 = vld [vmem:[#allocation2 + $0x150] sm:$0xff]  ;;  %1709 = vst.msk [vmem:[%s2608_s13 + $0x48] sm:$0xff] %vm1169_vm2, %v1645_v13  ;;  %v1511_v23 = vmul.f32 %v2586_v37, %v1440_v19  ;;  %1375 = vst.msk [vmem:[#allocation2 + $0x60] sm:$0xff] %vm1169_vm2, %v1310_v15  ;;  %v1311_v25 = vadd.f32 %v1247_v11, %v961_v21  ;;  %v1343_v26 = vadd.f32 %v1279_v12, %v1089_v22  ;;  %v963_v27 = vpop.f32.mrb[27].mxu0  ;;  %v1091_v28 = vpop.f32.mrb[27].mxu1  ;;  %v1251_v13 = vld [vmem:[#allocation2 + $0x88] sm:$0xff] }
 0x14a   : > { %1741 = vst.msk [vmem:[%s2608_s13 + $0x148] sm:$0xff] %vm1169_vm2, %v1677_v14  ;;  %v1543_v24 = vmul.f32 %v2586_v37, %v1472_v20  ;;  %1407 = vst.msk [vmem:[#allocation2 + $0x160] sm:$0xff] %vm1169_vm2, %v1342_v16  ;;  %v1441_v29 = vld [vmem:[#allocation2 + $0x58] sm:$0xff]  ;;  %v1283_v14 = vld [vmem:[#allocation2 + $0x188] sm:$0xff] }
 0x14b   : > { %v1473_v30 = vld [vmem:[#allocation2 + $0x158] sm:$0xff]  ;;  %v1582_v31 = vadd.f32 %v2591_v47, %v1511_v23  ;;  %v1512_v33 = vmul.f32 %v2586_v37, %v1441_v29  ;;  %1376 = vst.msk [vmem:[#allocation2 + $0x68] sm:$0xff] %vm1169_vm2, %v1311_v25  ;;  %1408 = vst.msk [vmem:[#allocation2 + $0x168] sm:$0xff] %vm1169_vm2, %v1343_v26 }
 0x14c   : > { %v1614_v32 = vadd.f32 %v2591_v47, %v1543_v24  ;;  %v1544_v34 = vmul.f32 %v2586_v37, %v1473_v30 }
 0x14d   : > { %v1646_v38 = vmax.f32 %v1582_v31, 0.0  ;;  %v1583_v40 = vadd.f32 %v2591_v47, %v1512_v33 }
 0x14e   : > { %v1678_v39 = vmax.f32 %v1614_v32, 0.0  ;;  %v1615_v41 = vadd.f32 %v2591_v47, %v1544_v34  ;;  %v966_v42 = vpop.f32.mrb[28].mxu0  ;;  %v1094_v43 = vpop.f32.mrb[28].mxu1 }
 0x14f   : > { %1710 = vst.msk [vmem:[%s2608_s13 + $0x50] sm:$0xff] %vm1169_vm2, %v1646_v38  ;;  %v1647_v46 = vmax.f32 %v1583_v40, 0.0  ;;  %v1312_v49 = vadd.f32 %v1248_v35, %v966_v42  ;;  %v1344_v50 = vadd.f32 %v1280_v36, %v1094_v43  ;;  %v968_v51 = vpop.f32.mrb[29].mxu0  ;;  %v1096_v52 = vpop.f32.mrb[29].mxu1  ;;  %v1252_v38 = vld [vmem:[#allocation2 + $0x90] sm:$0xff] }
 0x150   : > { %1742 = vst.msk [vmem:[%s2608_s13 + $0x150] sm:$0xff] %vm1169_vm2, %v1678_v39  ;;  %v1679_v48 = vmax.f32 %v1615_v41, 0.0  ;;  %v1442_v53 = vld [vmem:[#allocation2 + $0x60] sm:$0xff]  ;;  %v969_v55 = vpop.f32.mrb[30].mxu0  ;;  %v1097_v56 = vpop.f32.mrb[30].mxu1  ;;  %v1284_v39 = vld [vmem:[#allocation2 + $0x190] sm:$0xff] }
 0x151   : > { %v1474_v54 = vld [vmem:[#allocation2 + $0x160] sm:$0xff]  ;;  %1711 = vst.msk [vmem:[%s2608_s13 + $0x58] sm:$0xff] %vm1169_vm2, %v1647_v46  ;;  %v1513_v57 = vmul.f32 %v2586_v37, %v1442_v53  ;;  %1377 = vst.msk [vmem:[#allocation2 + $0x70] sm:$0xff] %vm1169_vm2, %v1312_v49  ;;  %v1313_v59 = vadd.f32 %v1249_v44, %v969_v55  ;;  %v1345_v60 = vadd.f32 %v1281_v45, %v1097_v56  ;;  %v971_v61 = vpop.f32.mrb[31].mxu0  ;;  %v1099_v62 = vpop.f32.mrb[31].mxu1  ;;  %v1253_v46 = vld [vmem:[#allocation2 + $0x98] sm:$0xff] }
 0x152   : > { %1743 = vst.msk [vmem:[%s2608_s13 + $0x158] sm:$0xff] %vm1169_vm2, %v1679_v48  ;;  %v1545_v58 = vmul.f32 %v2586_v37, %v1474_v54  ;;  %1409 = vst.msk [vmem:[#allocation2 + $0x170] sm:$0xff] %vm1169_vm2, %v1344_v50  ;;  %v1443_v63 = vld [vmem:[#allocation2 + $0x68] sm:$0xff]  ;;  %v1285_v48 = vld [vmem:[#allocation2 + $0x198] sm:$0xff] }
 0x153   : > { %v1475_v0 = vld [vmem:[#allocation2 + $0x168] sm:$0xff]  ;;  %v1584_v1 = vadd.f32 %v2591_v47, %v1513_v57  ;;  %v1514_v3 = vmul.f32 %v2586_v37, %v1443_v63  ;;  %1378 = vst.msk [vmem:[#allocation2 + $0x78] sm:$0xff] %vm1169_vm2, %v1313_v59  ;;  %1410 = vst.msk [vmem:[#allocation2 + $0x178] sm:$0xff] %vm1169_vm2, %v1345_v60 }
 0x154   : > { %v1616_v2 = vadd.f32 %v2591_v47, %v1545_v58  ;;  %v1546_v4 = vmul.f32 %v2586_v37, %v1475_v0 }
 0x155   : > { %v1648_v7 = vmax.f32 %v1584_v1, 0.0  ;;  %v1585_v9 = vadd.f32 %v2591_v47, %v1514_v3 }
 0x156   : > { %v1680_v8 = vmax.f32 %v1616_v2, 0.0  ;;  %v1617_v10 = vadd.f32 %v2591_v47, %v1546_v4  ;;  %v974_v11 = vpop.f32.mrb[32].mxu0  ;;  %v1102_v12 = vpop.f32.mrb[32].mxu1 }
 0x157   : > { %1712 = vst.msk [vmem:[%s2608_s13 + $0x60] sm:$0xff] %vm1169_vm2, %v1648_v7  ;;  %v1649_v15 = vmax.f32 %v1585_v9, 0.0  ;;  %v1314_v17 = vadd.f32 %v1250_v5, %v974_v11  ;;  %v1346_v18 = vadd.f32 %v1282_v6, %v1102_v12  ;;  %v976_v19 = vpop.f32.mrb[33].mxu0  ;;  %v1104_v20 = vpop.f32.mrb[33].mxu1  ;;  %v1254_v7 = vld [vmem:[#allocation2 + $0xa0] sm:$0xff] }
 0x158   : > { %1744 = vst.msk [vmem:[%s2608_s13 + $0x160] sm:$0xff] %vm1169_vm2, %v1680_v8  ;;  %v1681_v16 = vmax.f32 %v1617_v10, 0.0  ;;  %v1444_v21 = vld [vmem:[#allocation2 + $0x70] sm:$0xff]  ;;  %v977_v23 = vpop.f32.mrb[34].mxu0  ;;  %v1105_v24 = vpop.f32.mrb[34].mxu1  ;;  %v1286_v8 = vld [vmem:[#allocation2 + $0x1a0] sm:$0xff] }
 0x159   : > { %v1476_v22 = vld [vmem:[#allocation2 + $0x170] sm:$0xff]  ;;  %1713 = vst.msk [vmem:[%s2608_s13 + $0x68] sm:$0xff] %vm1169_vm2, %v1649_v15  ;;  %v1515_v25 = vmul.f32 %v2586_v37, %v1444_v21  ;;  %1379 = vst.msk [vmem:[#allocation2 + $0x80] sm:$0xff] %vm1169_vm2, %v1314_v17  ;;  %v1315_v27 = vadd.f32 %v1251_v13, %v977_v23  ;;  %v1347_v28 = vadd.f32 %v1283_v14, %v1105_v24  ;;  %v979_v29 = vpop.f32.mrb[35].mxu0  ;;  %v1107_v30 = vpop.f32.mrb[35].mxu1  ;;  %v1255_v15 = vld [vmem:[#allocation2 + $0xa8] sm:$0xff] }
 0x15a   : > { %1745 = vst.msk [vmem:[%s2608_s13 + $0x168] sm:$0xff] %vm1169_vm2, %v1681_v16  ;;  %v1547_v26 = vmul.f32 %v2586_v37, %v1476_v22  ;;  %1411 = vst.msk [vmem:[#allocation2 + $0x180] sm:$0xff] %vm1169_vm2, %v1346_v18  ;;  %v1445_v31 = vld [vmem:[#allocation2 + $0x78] sm:$0xff]  ;;  %v1287_v16 = vld [vmem:[#allocation2 + $0x1a8] sm:$0xff] }
 0x15b   : > { %v1477_v32 = vld [vmem:[#allocation2 + $0x178] sm:$0xff]  ;;  %v1586_v33 = vadd.f32 %v2591_v47, %v1515_v25  ;;  %v1516_v35 = vmul.f32 %v2586_v37, %v1445_v31  ;;  %1380 = vst.msk [vmem:[#allocation2 + $0x88] sm:$0xff] %vm1169_vm2, %v1315_v27  ;;  %1412 = vst.msk [vmem:[#allocation2 + $0x188] sm:$0xff] %vm1169_vm2, %v1347_v28 }
 0x15c   : > { %v1618_v34 = vadd.f32 %v2591_v47, %v1547_v26  ;;  %v1548_v36 = vmul.f32 %v2586_v37, %v1477_v32 }
 0x15d   : > { %v1650_v40 = vmax.f32 %v1586_v33, 0.0  ;;  %v1587_v42 = vadd.f32 %v2591_v47, %v1516_v35 }
 0x15e   : > { %v1682_v41 = vmax.f32 %v1618_v34, 0.0  ;;  %v1619_v43 = vadd.f32 %v2591_v47, %v1548_v36  ;;  %v982_v44 = vpop.f32.mrb[36].mxu0  ;;  %v1110_v45 = vpop.f32.mrb[36].mxu1 }
 0x15f   : > { %1714 = vst.msk [vmem:[%s2608_s13 + $0x70] sm:$0xff] %vm1169_vm2, %v1650_v40  ;;  %v1651_v49 = vmax.f32 %v1587_v42, 0.0  ;;  %v1316_v51 = vadd.f32 %v1252_v38, %v982_v44  ;;  %v1348_v52 = vadd.f32 %v1284_v39, %v1110_v45  ;;  %v984_v53 = vpop.f32.mrb[37].mxu0  ;;  %v1112_v54 = vpop.f32.mrb[37].mxu1  ;;  %v1256_v40 = vld [vmem:[#allocation2 + $0xb0] sm:$0xff] }
 0x160   : > { %1746 = vst.msk [vmem:[%s2608_s13 + $0x170] sm:$0xff] %vm1169_vm2, %v1682_v41  ;;  %v1683_v50 = vmax.f32 %v1619_v43, 0.0  ;;  %v1446_v55 = vld [vmem:[#allocation2 + $0x80] sm:$0xff]  ;;  %v985_v57 = vpop.f32.mrb[38].mxu0  ;;  %v1113_v58 = vpop.f32.mrb[38].mxu1  ;;  %v1288_v41 = vld [vmem:[#allocation2 + $0x1b0] sm:$0xff] }
 0x161   : > { %v1478_v56 = vld [vmem:[#allocation2 + $0x180] sm:$0xff]  ;;  %1715 = vst.msk [vmem:[%s2608_s13 + $0x78] sm:$0xff] %vm1169_vm2, %v1651_v49  ;;  %v1517_v59 = vmul.f32 %v2586_v37, %v1446_v55  ;;  %1381 = vst.msk [vmem:[#allocation2 + $0x90] sm:$0xff] %vm1169_vm2, %v1316_v51  ;;  %v1317_v61 = vadd.f32 %v1253_v46, %v985_v57  ;;  %v1349_v62 = vadd.f32 %v1285_v48, %v1113_v58  ;;  %v987_v63 = vpop.f32.mrb[39].mxu0  ;;  %v1115_v0 = vpop.f32.mrb[39].mxu1  ;;  %v1257_v49 = vld [vmem:[#allocation2 + $0xb8] sm:$0xff] }
 0x162   : > { %1747 = vst.msk [vmem:[%s2608_s13 + $0x178] sm:$0xff] %vm1169_vm2, %v1683_v50  ;;  %v1549_v60 = vmul.f32 %v2586_v37, %v1478_v56  ;;  %1413 = vst.msk [vmem:[#allocation2 + $0x190] sm:$0xff] %vm1169_vm2, %v1348_v52  ;;  %v1447_v1 = vld [vmem:[#allocation2 + $0x88] sm:$0xff]  ;;  %v1289_v50 = vld [vmem:[#allocation2 + $0x1b8] sm:$0xff] }
 0x163   : > { %v1479_v2 = vld [vmem:[#allocation2 + $0x188] sm:$0xff]  ;;  %v1588_v3 = vadd.f32 %v2591_v47, %v1517_v59  ;;  %v1518_v5 = vmul.f32 %v2586_v37, %v1447_v1  ;;  %1382 = vst.msk [vmem:[#allocation2 + $0x98] sm:$0xff] %vm1169_vm2, %v1317_v61  ;;  %1414 = vst.msk [vmem:[#allocation2 + $0x198] sm:$0xff] %vm1169_vm2, %v1349_v62 }
 0x164   : > { %v1620_v4 = vadd.f32 %v2591_v47, %v1549_v60  ;;  %v1550_v6 = vmul.f32 %v2586_v37, %v1479_v2 }
 0x165   : > { %v1652_v9 = vmax.f32 %v1588_v3, 0.0  ;;  %v1589_v11 = vadd.f32 %v2591_v47, %v1518_v5 }
 0x166   : > { %v1684_v10 = vmax.f32 %v1620_v4, 0.0  ;;  %v1621_v12 = vadd.f32 %v2591_v47, %v1550_v6  ;;  %v990_v13 = vpop.f32.mrb[40].mxu0  ;;  %v1118_v14 = vpop.f32.mrb[40].mxu1 }
 0x167   : > { %1716 = vst.msk [vmem:[%s2608_s13 + $0x80] sm:$0xff] %vm1169_vm2, %v1652_v9  ;;  %v1653_v17 = vmax.f32 %v1589_v11, 0.0  ;;  %v1318_v19 = vadd.f32 %v1254_v7, %v990_v13  ;;  %v1350_v20 = vadd.f32 %v1286_v8, %v1118_v14  ;;  %v992_v21 = vpop.f32.mrb[41].mxu0  ;;  %v1120_v22 = vpop.f32.mrb[41].mxu1  ;;  %v1258_v9 = vld [vmem:[#allocation2 + $0xc0] sm:$0xff] }
 0x168   : > { %1748 = vst.msk [vmem:[%s2608_s13 + $0x180] sm:$0xff] %vm1169_vm2, %v1684_v10  ;;  %v1685_v18 = vmax.f32 %v1621_v12, 0.0  ;;  %v1448_v23 = vld [vmem:[#allocation2 + $0x90] sm:$0xff]  ;;  %v993_v25 = vpop.f32.mrb[42].mxu0  ;;  %v1121_v26 = vpop.f32.mrb[42].mxu1  ;;  %v1290_v10 = vld [vmem:[#allocation2 + $0x1c0] sm:$0xff] }
 0x169   : > { %v1480_v24 = vld [vmem:[#allocation2 + $0x190] sm:$0xff]  ;;  %1717 = vst.msk [vmem:[%s2608_s13 + $0x88] sm:$0xff] %vm1169_vm2, %v1653_v17  ;;  %v1519_v27 = vmul.f32 %v2586_v37, %v1448_v23  ;;  %1383 = vst.msk [vmem:[#allocation2 + $0xa0] sm:$0xff] %vm1169_vm2, %v1318_v19  ;;  %v1319_v29 = vadd.f32 %v1255_v15, %v993_v25  ;;  %v1351_v30 = vadd.f32 %v1287_v16, %v1121_v26  ;;  %v995_v31 = vpop.f32.mrb[43].mxu0  ;;  %v1123_v32 = vpop.f32.mrb[43].mxu1  ;;  %v1259_v17 = vld [vmem:[#allocation2 + $0xc8] sm:$0xff] }
 0x16a   : > { %1749 = vst.msk [vmem:[%s2608_s13 + $0x188] sm:$0xff] %vm1169_vm2, %v1685_v18  ;;  %v1551_v28 = vmul.f32 %v2586_v37, %v1480_v24  ;;  %1415 = vst.msk [vmem:[#allocation2 + $0x1a0] sm:$0xff] %vm1169_vm2, %v1350_v20  ;;  %v1449_v33 = vld [vmem:[#allocation2 + $0x98] sm:$0xff]  ;;  %v1291_v18 = vld [vmem:[#allocation2 + $0x1c8] sm:$0xff] }
 0x16b   : > { %v1481_v34 = vld [vmem:[#allocation2 + $0x198] sm:$0xff]  ;;  %v1590_v35 = vadd.f32 %v2591_v47, %v1519_v27  ;;  %v1520_v38 = vmul.f32 %v2586_v37, %v1449_v33  ;;  %1384 = vst.msk [vmem:[#allocation2 + $0xa8] sm:$0xff] %vm1169_vm2, %v1319_v29  ;;  %1416 = vst.msk [vmem:[#allocation2 + $0x1a8] sm:$0xff] %vm1169_vm2, %v1351_v30 }
 0x16c   : > { %v1622_v36 = vadd.f32 %v2591_v47, %v1551_v28  ;;  %v1552_v39 = vmul.f32 %v2586_v37, %v1481_v34 }
 0x16d   : > { %v1654_v42 = vmax.f32 %v1590_v35, 0.0  ;;  %v1591_v44 = vadd.f32 %v2591_v47, %v1520_v38 }
 0x16e   : > { %v1686_v43 = vmax.f32 %v1622_v36, 0.0  ;;  %v1623_v45 = vadd.f32 %v2591_v47, %v1552_v39  ;;  %v998_v46 = vpop.f32.mrb[44].mxu0  ;;  %v1126_v48 = vpop.f32.mrb[44].mxu1 }
 0x16f   : > { %1718 = vst.msk [vmem:[%s2608_s13 + $0x90] sm:$0xff] %vm1169_vm2, %v1654_v42  ;;  %v1655_v51 = vmax.f32 %v1591_v44, 0.0  ;;  %v1320_v53 = vadd.f32 %v1256_v40, %v998_v46  ;;  %v1352_v54 = vadd.f32 %v1288_v41, %v1126_v48  ;;  %v1000_v55 = vpop.f32.mrb[45].mxu0  ;;  %v1128_v56 = vpop.f32.mrb[45].mxu1  ;;  %v1260_v42 = vld [vmem:[#allocation2 + $0xd0] sm:$0xff] }
 0x170   : > { %1750 = vst.msk [vmem:[%s2608_s13 + $0x190] sm:$0xff] %vm1169_vm2, %v1686_v43  ;;  %v1687_v52 = vmax.f32 %v1623_v45, 0.0  ;;  %v1450_v57 = vld [vmem:[#allocation2 + $0xa0] sm:$0xff]  ;;  %v1001_v59 = vpop.f32.mrb[46].mxu0  ;;  %v1129_v60 = vpop.f32.mrb[46].mxu1  ;;  %v1292_v43 = vld [vmem:[#allocation2 + $0x1d0] sm:$0xff] }
 0x171   : > { %v1482_v58 = vld [vmem:[#allocation2 + $0x1a0] sm:$0xff]  ;;  %1719 = vst.msk [vmem:[%s2608_s13 + $0x98] sm:$0xff] %vm1169_vm2, %v1655_v51  ;;  %v1521_v61 = vmul.f32 %v2586_v37, %v1450_v57  ;;  %1385 = vst.msk [vmem:[#allocation2 + $0xb0] sm:$0xff] %vm1169_vm2, %v1320_v53  ;;  %v1321_v63 = vadd.f32 %v1257_v49, %v1001_v59  ;;  %v1353_v0 = vadd.f32 %v1289_v50, %v1129_v60  ;;  %v1003_v1 = vpop.f32.mrb[47].mxu0  ;;  %v1131_v2 = vpop.f32.mrb[47].mxu1  ;;  %v1261_v51 = vld [vmem:[#allocation2 + $0xd8] sm:$0xff] }
 0x172   : > { %1751 = vst.msk [vmem:[%s2608_s13 + $0x198] sm:$0xff] %vm1169_vm2, %v1687_v52  ;;  %v1553_v62 = vmul.f32 %v2586_v37, %v1482_v58  ;;  %1417 = vst.msk [vmem:[#allocation2 + $0x1b0] sm:$0xff] %vm1169_vm2, %v1352_v54  ;;  %v1451_v3 = vld [vmem:[#allocation2 + $0xa8] sm:$0xff]  ;;  %v1293_v52 = vld [vmem:[#allocation2 + $0x1d8] sm:$0xff] }
 0x173   : > { %v1483_v4 = vld [vmem:[#allocation2 + $0x1a8] sm:$0xff]  ;;  %v1592_v5 = vadd.f32 %v2591_v47, %v1521_v61  ;;  %v1522_v7 = vmul.f32 %v2586_v37, %v1451_v3  ;;  %1386 = vst.msk [vmem:[#allocation2 + $0xb8] sm:$0xff] %vm1169_vm2, %v1321_v63  ;;  %1418 = vst.msk [vmem:[#allocation2 + $0x1b8] sm:$0xff] %vm1169_vm2, %v1353_v0 }
 0x174   : > { %v1624_v6 = vadd.f32 %v2591_v47, %v1553_v62  ;;  %v1554_v8 = vmul.f32 %v2586_v37, %v1483_v4 }
 0x175   : > { %v1656_v11 = vmax.f32 %v1592_v5, 0.0  ;;  %v1593_v13 = vadd.f32 %v2591_v47, %v1522_v7 }
 0x176   : > { %v1688_v12 = vmax.f32 %v1624_v6, 0.0  ;;  %v1625_v14 = vadd.f32 %v2591_v47, %v1554_v8  ;;  %v1006_v15 = vpop.f32.mrb[48].mxu0  ;;  %v1134_v16 = vpop.f32.mrb[48].mxu1 }
 0x177   : > { %1720 = vst.msk [vmem:[%s2608_s13 + $0xa0] sm:$0xff] %vm1169_vm2, %v1656_v11  ;;  %v1657_v19 = vmax.f32 %v1593_v13, 0.0  ;;  %v1322_v21 = vadd.f32 %v1258_v9, %v1006_v15  ;;  %v1354_v22 = vadd.f32 %v1290_v10, %v1134_v16  ;;  %v1008_v23 = vpop.f32.mrb[49].mxu0  ;;  %v1136_v24 = vpop.f32.mrb[49].mxu1  ;;  %v1262_v11 = vld [vmem:[#allocation2 + $0xe0] sm:$0xff] }
 0x178   : > { %1752 = vst.msk [vmem:[%s2608_s13 + $0x1a0] sm:$0xff] %vm1169_vm2, %v1688_v12  ;;  %v1689_v20 = vmax.f32 %v1625_v14, 0.0  ;;  %v1452_v25 = vld [vmem:[#allocation2 + $0xb0] sm:$0xff]  ;;  %v1009_v27 = vpop.f32.mrb[50].mxu0  ;;  %v1137_v28 = vpop.f32.mrb[50].mxu1  ;;  %v1294_v12 = vld [vmem:[#allocation2 + $0x1e0] sm:$0xff] }
 0x179   : > { %v1484_v26 = vld [vmem:[#allocation2 + $0x1b0] sm:$0xff]  ;;  %1721 = vst.msk [vmem:[%s2608_s13 + $0xa8] sm:$0xff] %vm1169_vm2, %v1657_v19  ;;  %v1523_v29 = vmul.f32 %v2586_v37, %v1452_v25  ;;  %1387 = vst.msk [vmem:[#allocation2 + $0xc0] sm:$0xff] %vm1169_vm2, %v1322_v21  ;;  %v1323_v31 = vadd.f32 %v1259_v17, %v1009_v27  ;;  %v1355_v32 = vadd.f32 %v1291_v18, %v1137_v28  ;;  %v1011_v33 = vpop.f32.mrb[51].mxu0  ;;  %v1139_v34 = vpop.f32.mrb[51].mxu1  ;;  %v1263_v19 = vld [vmem:[#allocation2 + $0xe8] sm:$0xff] }
 0x17a   : > { %1753 = vst.msk [vmem:[%s2608_s13 + $0x1a8] sm:$0xff] %vm1169_vm2, %v1689_v20  ;;  %v1555_v30 = vmul.f32 %v2586_v37, %v1484_v26  ;;  %1419 = vst.msk [vmem:[#allocation2 + $0x1c0] sm:$0xff] %vm1169_vm2, %v1354_v22  ;;  %v1453_v35 = vld [vmem:[#allocation2 + $0xb8] sm:$0xff]  ;;  %v1295_v20 = vld [vmem:[#allocation2 + $0x1e8] sm:$0xff] }
 0x17b   : > { %v1485_v36 = vld [vmem:[#allocation2 + $0x1b8] sm:$0xff]  ;;  %v1594_v38 = vadd.f32 %v2591_v47, %v1523_v29  ;;  %v1524_v40 = vmul.f32 %v2586_v37, %v1453_v35  ;;  %1388 = vst.msk [vmem:[#allocation2 + $0xc8] sm:$0xff] %vm1169_vm2, %v1323_v31  ;;  %1420 = vst.msk [vmem:[#allocation2 + $0x1c8] sm:$0xff] %vm1169_vm2, %v1355_v32  ;;  %v2863_v29 = vld [vmem:[%s2937_s2] ss:$0 sm:$0xff] }
 0x17c   : > { %v1626_v39 = vadd.f32 %v2591_v47, %v1555_v30  ;;  %v1556_v41 = vmul.f32 %v2586_v37, %v1485_v36 }
 0x17d   : > { %v1658_v44 = vmax.f32 %v1594_v38, 0.0  ;;  %v1595_v46 = vadd.f32 %v2591_v47, %v1524_v40 }
 0x17e   : > { %v1690_v45 = vmax.f32 %v1626_v39, 0.0  ;;  %v1627_v48 = vadd.f32 %v2591_v47, %v1556_v41  ;;  %v1014_v49 = vpop.f32.mrb[52].mxu0  ;;  %v1142_v50 = vpop.f32.mrb[52].mxu1  ;;  %v2872_v39 = vld [vmem:[%s2938_s3] ss:$0 sm:$0xff] }
 0x17f   : > { %1722 = vst.msk [vmem:[%s2608_s13 + $0xb0] sm:$0xff] %vm1169_vm2, %v1658_v44  ;;  %v1659_v53 = vmax.f32 %v1595_v46, 0.0  ;;  %v1324_v55 = vadd.f32 %v1260_v42, %v1014_v49  ;;  %v1356_v56 = vadd.f32 %v1292_v43, %v1142_v50  ;;  %v1016_v57 = vpop.f32.mrb[53].mxu0  ;;  %v1144_v58 = vpop.f32.mrb[53].mxu1  ;;  %v1264_v44 = vld [vmem:[#allocation2 + $0xf0] sm:$0xff] }
 0x180   : > { %1754 = vst.msk [vmem:[%s2608_s13 + $0x1b0] sm:$0xff] %vm1169_vm2, %v1690_v45  ;;  %v1691_v54 = vmax.f32 %v1627_v48, 0.0  ;;  %v1454_v59 = vld [vmem:[#allocation2 + $0xc0] sm:$0xff]  ;;  %v1017_v61 = vpop.f32.mrb[54].mxu0  ;;  %v1145_v62 = vpop.f32.mrb[54].mxu1  ;;  %v1296_v45 = vld [vmem:[#allocation2 + $0x1f0] sm:$0xff] }
 0x181   : > { %v1486_v60 = vld [vmem:[#allocation2 + $0x1c0] sm:$0xff]  ;;  %1723 = vst.msk [vmem:[%s2608_s13 + $0xb8] sm:$0xff] %vm1169_vm2, %v1659_v53  ;;  %v1525_v63 = vmul.f32 %v2586_v37, %v1454_v59  ;;  %1389 = vst.msk [vmem:[#allocation2 + $0xd0] sm:$0xff] %vm1169_vm2, %v1324_v55  ;;  %v1325_v1 = vadd.f32 %v1261_v51, %v1017_v61  ;;  %v1357_v2 = vadd.f32 %v1293_v52, %v1145_v62  ;;  %v1019_v3 = vpop.f32.mrb[55].mxu0  ;;  %v1147_v4 = vpop.f32.mrb[55].mxu1  ;;  %v1265_v53 = vld [vmem:[#allocation2 + $0xf8] sm:$0xff] }
 0x182   : > { %1755 = vst.msk [vmem:[%s2608_s13 + $0x1b8] sm:$0xff] %vm1169_vm2, %v1691_v54  ;;  %v1557_v0 = vmul.f32 %v2586_v37, %v1486_v60  ;;  %1421 = vst.msk [vmem:[#allocation2 + $0x1d0] sm:$0xff] %vm1169_vm2, %v1356_v56  ;;  %v1455_v5 = vld [vmem:[#allocation2 + $0xc8] sm:$0xff]  ;;  %v1297_v54 = vld [vmem:[#allocation2 + $0x1f8] sm:$0xff] }
 0x183   : > { %v1487_v6 = vld [vmem:[#allocation2 + $0x1c8] sm:$0xff]  ;;  %v1596_v7 = vadd.f32 %v2591_v47, %v1525_v63  ;;  %v1526_v9 = vmul.f32 %v2586_v37, %v1455_v5  ;;  %1390 = vst.msk [vmem:[#allocation2 + $0xd8] sm:$0xff] %vm1169_vm2, %v1325_v1  ;;  %1422 = vst.msk [vmem:[#allocation2 + $0x1d8] sm:$0xff] %vm1169_vm2, %v1357_v2 }
 0x184   : > { %v1628_v8 = vadd.f32 %v2591_v47, %v1557_v0  ;;  %v1558_v10 = vmul.f32 %v2586_v37, %v1487_v6 }
 0x185   : > { %v1660_v13 = vmax.f32 %v1596_v7, 0.0  ;;  %v1597_v15 = vadd.f32 %v2591_v47, %v1526_v9 }
 0x186   : > { %v1692_v14 = vmax.f32 %v1628_v8, 0.0  ;;  %v1629_v16 = vadd.f32 %v2591_v47, %v1558_v10  ;;  %v1022_v17 = vpop.f32.mrb[56].mxu0  ;;  %v1150_v18 = vpop.f32.mrb[56].mxu1 }
 0x187   : > { %1724 = vst.msk [vmem:[%s2608_s13 + $0xc0] sm:$0xff] %vm1169_vm2, %v1660_v13  ;;  %v1661_v37 = vmax.f32 %v1597_v15, 0.0  ;;  %v1326_v22 = vadd.f32 %v1262_v11, %v1022_v17  ;;  %v1358_v23 = vadd.f32 %v1294_v12, %v1150_v18  ;;  %v1024_v24 = vpop.f32.mrb[57].mxu0  ;;  %v1152_v25 = vpop.f32.mrb[57].mxu1 }
 0x188   : > { %1756 = vst.msk [vmem:[%s2608_s13 + $0x1c0] sm:$0xff] %vm1169_vm2, %v1692_v14  ;;  %v1693_v21 = vmax.f32 %v1629_v16, 0.0  ;;  %v1456_v26 = vld [vmem:[#allocation2 + $0xd0] sm:$0xff]  ;;  %v1025_v28 = vpop.f32.mrb[58].mxu0  ;;  %v1153_v47 = vpop.f32.mrb[58].mxu1 }
 0x189   : > { %v1488_v27 = vld [vmem:[#allocation2 + $0x1d0] sm:$0xff]  ;;  %1725 = vst.msk [vmem:[%s2608_s13 + $0xc8] sm:$0xff] %vm1169_vm2, %v1661_v37  ;;  %v1527_v30 = vmul.f32 %v2863_v29, %v1456_v26  ;;  %1391 = vst.msk [vmem:[#allocation2 + $0xe0] sm:$0xff] %vm1169_vm2, %v1326_v22  ;;  %v1327_v32 = vadd.f32 %v1263_v19, %v1025_v28  ;;  %v1359_v33 = vadd.f32 %v1295_v20, %v1153_v47  ;;  %v1027_v34 = vpop.f32.mrb[59].mxu0  ;;  %v1155_v35 = vpop.f32.mrb[59].mxu1 }
 0x18a   : > { %1757 = vst.msk [vmem:[%s2608_s13 + $0x1c8] sm:$0xff] %vm1169_vm2, %v1693_v21  ;;  %v1559_v31 = vmul.f32 %v2863_v29, %v1488_v27  ;;  %1423 = vst.msk [vmem:[#allocation2 + $0x1e0] sm:$0xff] %vm1169_vm2, %v1358_v23  ;;  %v1457_v36 = vld [vmem:[#allocation2 + $0xd8] sm:$0xff] }
 0x18b   : > { %v1489_v38 = vld [vmem:[#allocation2 + $0x1d8] sm:$0xff]  ;;  %v1598_v40 = vadd.f32 %v2872_v39, %v1527_v30  ;;  %v1528_v42 = vmul.f32 %v2863_v29, %v1457_v36  ;;  %1392 = vst.msk [vmem:[#allocation2 + $0xe8] sm:$0xff] %vm1169_vm2, %v1327_v32  ;;  %1424 = vst.msk [vmem:[#allocation2 + $0x1e8] sm:$0xff] %vm1169_vm2, %v1359_v33 }
 0x18c   : > { %v1630_v41 = vadd.f32 %v2872_v39, %v1559_v31  ;;  %v1560_v43 = vmul.f32 %v2863_v29, %v1489_v38 }
 0x18d   : > { %v1662_v46 = vmax.f32 %v1598_v40, 0.0  ;;  %v1599_v49 = vadd.f32 %v2872_v39, %v1528_v42 }
 0x18e   : > { %v1694_v48 = vmax.f32 %v1630_v41, 0.0  ;;  %v1631_v50 = vadd.f32 %v2872_v39, %v1560_v43  ;;  %v1030_v51 = vpop.f32.mrb[60].mxu0  ;;  %v1158_v52 = vpop.f32.mrb[60].mxu1 }
 0x18f   : > { %1726 = vst.msk [vmem:[%s2608_s13 + $0xd0] sm:$0xff] %vm1169_vm2, %v1662_v46  ;;  %v1663_v55 = vmax.f32 %v1599_v49, 0.0  ;;  %v1328_v57 = vadd.f32 %v1264_v44, %v1030_v51  ;;  %v1360_v58 = vadd.f32 %v1296_v45, %v1158_v52  ;;  %v1032_v59 = vpop.f32.mrb[61].mxu0  ;;  %v1160_v60 = vpop.f32.mrb[61].mxu1 }
 0x190   : > { %1758 = vst.msk [vmem:[%s2608_s13 + $0x1d0] sm:$0xff] %vm1169_vm2, %v1694_v48  ;;  %v1695_v56 = vmax.f32 %v1631_v50, 0.0  ;;  %v1458_v61 = vld [vmem:[#allocation2 + $0xe0] sm:$0xff]  ;;  %v1033_v63 = vpop.f32.mrb[62].mxu0  ;;  %v1161_v0 = vpop.f32.mrb[62].mxu1 }
 0x191   : > { %v1490_v62 = vld [vmem:[#allocation2 + $0x1e0] sm:$0xff]  ;;  %1727 = vst.msk [vmem:[%s2608_s13 + $0xd8] sm:$0xff] %vm1169_vm2, %v1663_v55  ;;  %v1529_v1 = vmul.f32 %v2863_v29, %v1458_v61  ;;  %1393 = vst.msk [vmem:[#allocation2 + $0xf0] sm:$0xff] %vm1169_vm2, %v1328_v57  ;;  %v1329_v3 = vadd.f32 %v1265_v53, %v1033_v63  ;;  %v1361_v4 = vadd.f32 %v1297_v54, %v1161_v0  ;;  %v1035_v5 = vpop.f32.mrb[63].mxu0  ;;  %v1163_v6 = vpop.f32.mrb[63].mxu1 }
 0x192   : > { %1759 = vst.msk [vmem:[%s2608_s13 + $0x1d8] sm:$0xff] %vm1169_vm2, %v1695_v56  ;;  %v1561_v2 = vmul.f32 %v2863_v29, %v1490_v62  ;;  %1425 = vst.msk [vmem:[#allocation2 + $0x1f0] sm:$0xff] %vm1169_vm2, %v1360_v58  ;;  %v1459_v7 = vld [vmem:[#allocation2 + $0xe8] sm:$0xff] }
 0x193   : > { %v1491_v8 = vld [vmem:[#allocation2 + $0x1e8] sm:$0xff]  ;;  %v1600_v9 = vadd.f32 %v2872_v39, %v1529_v1  ;;  %v1530_v11 = vmul.f32 %v2863_v29, %v1459_v7  ;;  %1394 = vst.msk [vmem:[#allocation2 + $0xf8] sm:$0xff] %vm1169_vm2, %v1329_v3  ;;  %1426 = vst.msk [vmem:[#allocation2 + $0x1f8] sm:$0xff] %vm1169_vm2, %v1361_v4 }
 0x194   : > { %v1632_v10 = vadd.f32 %v2872_v39, %v1561_v2  ;;  %v1562_v12 = vmul.f32 %v2863_v29, %v1491_v8 }
 0x195   : > { %v1664_v13 = vmax.f32 %v1600_v9, 0.0  ;;  %v1601_v15 = vadd.f32 %v2872_v39, %v1530_v11 }
 0x196   : > { %v1696_v14 = vmax.f32 %v1632_v10, 0.0  ;;  %v1633_v16 = vadd.f32 %v2872_v39, %v1562_v12 }
 0x197   : > { %1728 = vst.msk [vmem:[%s2608_s13 + $0xe0] sm:$0xff] %vm1169_vm2, %v1664_v13  ;;  %v1665_v17 = vmax.f32 %v1601_v15, 0.0 }
 0x198   : > { %1760 = vst.msk [vmem:[%s2608_s13 + $0x1e0] sm:$0xff] %vm1169_vm2, %v1696_v14  ;;  %v1697_v18 = vmax.f32 %v1633_v16, 0.0  ;;  %v1460_v19 = vld [vmem:[#allocation2 + $0xf0] sm:$0xff] }
 0x199   : > { %v1492_v20 = vld [vmem:[#allocation2 + $0x1f0] sm:$0xff]  ;;  %1729 = vst.msk [vmem:[%s2608_s13 + $0xe8] sm:$0xff] %vm1169_vm2, %v1665_v17  ;;  %v1531_v37 = vmul.f32 %v2863_v29, %v1460_v19 }
 0x19a   : > { %1761 = vst.msk [vmem:[%s2608_s13 + $0x1e8] sm:$0xff] %vm1169_vm2, %v1697_v18  ;;  %v1563_v21 = vmul.f32 %v2863_v29, %v1492_v20  ;;  %v1461_v22 = vld [vmem:[#allocation2 + $0xf8] sm:$0xff] }
 0x19b   : > { %v1493_v23 = vld [vmem:[#allocation2 + $0x1f8] sm:$0xff]  ;;  %v1602_v24 = vadd.f32 %v2872_v39, %v1531_v37  ;;  %v1532_v26 = vmul.f32 %v2863_v29, %v1461_v22 }
 0x19c   : > { %v1634_v25 = vadd.f32 %v2872_v39, %v1563_v21  ;;  %v1564_v27 = vmul.f32 %v2863_v29, %v1493_v23 }
 0x19d   : > { %v1666_v28 = vmax.f32 %v1602_v24, 0.0  ;;  %v1603_v30 = vadd.f32 %v2872_v39, %v1532_v26 }
 0x19e   : > { %v1698_v47 = vmax.f32 %v1634_v25, 0.0  ;;  %v1635_v31 = vadd.f32 %v2872_v39, %v1564_v27 }
 0x19f   : > { %1730 = vst.msk [vmem:[%s2608_s13 + $0xf0] sm:$0xff] %vm1169_vm2, %v1666_v28  ;;  %v1667_v32 = vmax.f32 %v1603_v30, 0.0 }
 0x1a0   : > { %1762 = vst.msk [vmem:[%s2608_s13 + $0x1f0] sm:$0xff] %vm1169_vm2, %v1698_v47  ;;  %v1699_v33 = vmax.f32 %v1635_v31, 0.0 }
 0x1a1   : > { %1731 = vst.msk [vmem:[%s2608_s13 + $0xf8] sm:$0xff] %vm1169_vm2, %v1667_v32 }
 0x1a2   : > { %1763 = vst.msk [vmem:[%s2608_s13 + $0x1f8] sm:$0xff] %vm1169_vm2, %v1699_v33 }
 0x1a3 PF: > { %s14_s17 = sadd.s32 1, %s2216_s17   ;;  %s2940_s15 = smov %s2212_s16 }
 0x1a4   : > { %p11_p5 = scmp.ge.s32.totalorder %s14_s17, 4   ;;  %s2941_s16 = smov %s2943_s18 }
 0x1a6   :  { %13 = sbr.rel (!%p11_p5) target bundleno = 2 (0x2), region = 83 }

</bundles_post_ra>
